<compile_context>
chip_gen: v7x
topology: tpu7x:2x2x1
jax: 0.10.0
libtpu: 0.0.40
codegen_flags: <defaults>
</compile_context>

<pallas_src>
import functools
import math

import jax
import jax.numpy as jnp
from jax.experimental import pallas as pl
from jax.experimental.pallas import tpu as pltpu

# ----------------------- tiny synthetic BERT config -----------------------
VOCAB = 100
HIDDEN = 32
N_LAYERS = 2
N_HEADS = 4
HEAD_DIM = HIDDEN // N_HEADS
INTERMEDIATE = 64
MAX_POS = 32
TYPE_VOCAB = 2
LN_EPS = 1e-12


# ------------------------------ kernel helpers ------------------------------
def _layernorm(x, gamma, beta):
    """LayerNorm over the last dim, f32 math (v5e-safe)."""
    mu = jnp.mean(x, axis=-1, keepdims=True)
    var = jnp.mean(jnp.square(x - mu), axis=-1, keepdims=True)
    return (x - mu) * jax.lax.rsqrt(var + LN_EPS) * gamma + beta


# --------------------- fused whole-stack encoder kernel ---------------------
def _bert_stack_kernel(emb_ref, embg_ref, embb_ref,
                       wq_ref, wk_ref, wv_ref, bq_ref, bk_ref, bv_ref,
                       wo_ref, bo_ref, ln1g_ref, ln1b_ref,
                       wi_ref, bi_ref, wo2_ref, bo2_ref, ln2g_ref, ln2b_ref,
                       o_ref, h_scr, ctx_scr,
                       *, batch, seq, n_heads, head_dim):
    l = pl.program_id(0)

    # Layer 0: fused embedding LayerNorm initializes the resident hidden slab.
    @pl.when(l == 0)
    def _():
        h_scr[...] = _layernorm(emb_ref[...].astype(jnp.float32),
                                embg_ref[...], embb_ref[...])

    h = h_scr[...]                               # [M, H] f32, M = B*S
    h_bf = h.astype(jnp.bfloat16)                # bf16 MXU operand

    # ---- (1) self-attention --------------------------------------------
    # Per-head Q/K/V via leading-axis weight indexing (no lane slicing of a
    # fused qkv slab). 1/sqrt(D) is pre-folded into wq at init.
    # Static loops: n_heads * batch = 8 bodies here; at real head counts (12)
    # switch to lax.fori_loop(..., unroll=True) to bound vreg live ranges.
    for hd in range(n_heads):
        q = jnp.dot(h_bf, wq_ref[0, hd],
                    preferred_element_type=jnp.float32) + bq_ref[0, hd]
        k = jnp.dot(h_bf, wk_ref[0, hd],
                    preferred_element_type=jnp.float32) + bk_ref[0, hd]
        v = jnp.dot(h_bf, wv_ref[0, hd],
                    preferred_element_type=jnp.float32) + bv_ref[0, hd]
        for b in range(batch):
            r0 = b * seq                          # aligned sublane offset
            qb = q[r0:r0 + seq].astype(jnp.bfloat16)
            kb = k[r0:r0 + seq].astype(jnp.bfloat16)
            vb = v[r0:r0 + seq].astype(jnp.bfloat16)
            # q @ k^T without an explicit transpose of k (contract 1 vs 1).
            s = jax.lax.dot_general(qb, kb, (((1,), (1,)), ((), ())),
                                    preferred_element_type=jnp.float32)
            s = s - jnp.max(s, axis=-1, keepdims=True)
            p = jnp.exp(s)
            p = p * pl.reciprocal(jnp.sum(p, axis=-1, keepdims=True),
                                  approx=True)
            ctx = jnp.dot(p.astype(jnp.bfloat16), vb,
                          preferred_element_type=jnp.float32)
            ctx_scr[r0:r0 + seq, hd * head_dim:(hd + 1) * head_dim] = ctx

    # Output projection: single K=H matmul over the assembled ctx slab
    # (replaces N_HEADS folded K=head_dim matmuls).
    attn = jnp.dot(ctx_scr[...].astype(jnp.bfloat16), wo_ref[0],
                   preferred_element_type=jnp.float32) + bo_ref[0]

    # ---- (2) Add & LayerNorm 1 (f32 elementwise) -------------------------
    h1 = _layernorm(attn + h, ln1g_ref[0], ln1b_ref[0])

    # ---- (3) FFN ----------------------------------------------------------
    ff = jnp.dot(h1.astype(jnp.bfloat16), wi_ref[0],
                 preferred_element_type=jnp.float32) + bi_ref[0]
    # TODO(synk): HF bert-base uses erf-exact GELU; tanh approximation keeps
    # the elementwise path on the EUP.
    ff = jax.nn.gelu(ff, approximate=True)
    ff = jnp.dot(ff.astype(jnp.bfloat16), wo2_ref[0],
                 preferred_element_type=jnp.float32) + bo2_ref[0]

    # ---- (4) Add & LayerNorm 2 -> resident hidden + output slab ----------
    # Output block index is constant over the layer axis, so only the final
    # layer's value is written back to HBM.
    h2 = _layernorm(ff + h1, ln2g_ref[0], ln2b_ref[0])
    h_scr[...] = h2
    o_ref[...] = h2.astype(o_ref.dtype)


def bert_encoder_stack(emb, params, *, batch, seq):
    """Run the full encoder stack on the [B*S, H] embedding slab."""
    M, H = emb.shape
    I = INTERMEDIATE
    kernel = functools.partial(_bert_stack_kernel, batch=batch, seq=seq,
                               n_heads=N_HEADS, head_dim=HEAD_DIM)

    def per_layer(shape):
        # stacked [L, ...] weight: pick layer l's block.
        return pl.BlockSpec((1,) + shape, lambda l, _s=shape: (l,) + (0,) * len(_s))

    def const(shape):
        # whole array, same block every layer step (stays VMEM-resident).
        return pl.BlockSpec(shape, lambda l, _s=shape: (0,) * len(_s))

    return pl.pallas_call(
        kernel,
        out_shape=jax.ShapeDtypeStruct((M, H), jnp.float32),
        grid=(N_LAYERS,),
        in_specs=[
            const((M, H)),                        # emb slab
            const((1, H)), const((1, H)),         # embedding LN gamma / beta
            per_layer((N_HEADS, H, HEAD_DIM)),    # wq (scale folded in)
            per_layer((N_HEADS, H, HEAD_DIM)),    # wk
            per_layer((N_HEADS, H, HEAD_DIM)),    # wv
            per_layer((N_HEADS, 1, HEAD_DIM)),    # bq
            per_layer((N_HEADS, 1, HEAD_DIM)),    # bk
            per_layer((N_HEADS, 1, HEAD_DIM)),    # bv
            per_layer((H, H)),                    # wo
            per_layer((1, H)),                    # bo
            per_layer((1, H)), per_layer((1, H)),  # ln1 gamma / beta
            per_layer((H, I)),                    # wi
            per_layer((1, I)),                    # bi
            per_layer((I, H)),                    # wo2
            per_layer((1, H)),                    # bo2
            per_layer((1, H)), per_layer((1, H)),  # ln2 gamma / beta
        ],
        out_specs=pl.BlockSpec((M, H), lambda l: (0, 0)),
        scratch_shapes=[
            pltpu.VMEM((M, H), jnp.float32),      # resident hidden state
            pltpu.VMEM((M, H), jnp.float32),      # per-layer ctx slab
        ],
        compiler_params=pltpu.CompilerParams(
            dimension_semantics=("arbitrary",)),  # layers are sequential
    )(emb, params["emb_ln_g"], params["emb_ln_b"],
      params["wq"], params["wk"], params["wv"],
      params["bq"], params["bk"], params["bv"],
      params["wo"], params["bo"], params["ln1_g"], params["ln1_b"],
      params["wi"], params["bi"], params["wo2"], params["bo2"],
      params["ln2_g"], params["ln2_b"])


# --------------------------- parameter construction -------------------------
def init_params(key):
    def normal(k, shape, scale=0.02):
        return scale * jax.random.normal(k, shape, dtype=jnp.float32)

    ks = jax.random.split(key, 9)
    attn_scale = 1.0 / math.sqrt(HEAD_DIM)
    bf = jnp.bfloat16
    return {
        "word_emb": normal(ks[0], (VOCAB, HIDDEN)),
        "pos_emb": normal(ks[1], (MAX_POS, HIDDEN)),
        "type_emb": normal(ks[2], (TYPE_VOCAB, HIDDEN)),
        "emb_ln_g": jnp.ones((1, HIDDEN), jnp.float32),
        "emb_ln_b": jnp.zeros((1, HIDDEN), jnp.float32),
        # Attention weights: per-head layout [L, NH, H, D], stored bf16 (MXU
        # native dtype); 1/sqrt(D) folded into the Q path at init (free).
        "wq": (normal(ks[3], (N_LAYERS, N_HEADS, HIDDEN, HEAD_DIM))
               * attn_scale).astype(bf),
        "wk": normal(ks[4], (N_LAYERS, N_HEADS, HIDDEN, HEAD_DIM)).astype(bf),
        "wv": normal(ks[5], (N_LAYERS, N_HEADS, HIDDEN, HEAD_DIM)).astype(bf),
        "bq": jnp.zeros((N_LAYERS, N_HEADS, 1, HEAD_DIM), jnp.float32),
        "bk": jnp.zeros((N_LAYERS, N_HEADS, 1, HEAD_DIM), jnp.float32),
        "bv": jnp.zeros((N_LAYERS, N_HEADS, 1, HEAD_DIM), jnp.float32),
        "wo": normal(ks[6], (N_LAYERS, HIDDEN, HIDDEN)).astype(bf),
        "bo": jnp.zeros((N_LAYERS, 1, HIDDEN), jnp.float32),
        "ln1_g": jnp.ones((N_LAYERS, 1, HIDDEN), jnp.float32),
        "ln1_b": jnp.zeros((N_LAYERS, 1, HIDDEN), jnp.float32),
        "wi": normal(ks[7], (N_LAYERS, HIDDEN, INTERMEDIATE)).astype(bf),
        "bi": jnp.zeros((N_LAYERS, 1, INTERMEDIATE), jnp.float32),
        "wo2": normal(ks[8], (N_LAYERS, INTERMEDIATE, HIDDEN)).astype(bf),
        "bo2": jnp.zeros((N_LAYERS, 1, HIDDEN), jnp.float32),
        "ln2_g": jnp.ones((N_LAYERS, 1, HIDDEN), jnp.float32),
        "ln2_b": jnp.zeros((N_LAYERS, 1, HIDDEN), jnp.float32),
    }


# --------------------------------- forward ---------------------------------
def bert_forward(params, x):
    """x: [B, S] int32 token ids -> last hidden state [B, S, HIDDEN]."""
    B, S = x.shape
    # Embedding lookups are gathers: kept as plain-JAX glue outside Pallas.
    emb = (
        jnp.take(params["word_emb"], x, axis=0)
        + params["pos_emb"][:S][None, :, :]
        + params["type_emb"][0][None, None, :]        # token_type_ids == 0
    )
    h = bert_encoder_stack(emb.reshape(B * S, HIDDEN), params, batch=B, seq=S)
    return h.reshape(B, S, HIDDEN)


# ----------------------------------- main -----------------------------------
if __name__ == "__main__":
    root_key = jax.random.PRNGKey(0)
    pkey, xkey = jax.random.split(root_key)

    params = init_params(pkey)
    x = jax.random.randint(xkey, (2, 8), 0, VOCAB, dtype=jnp.int32)  # [B=2, S=8]

    out = jax.block_until_ready(jax.jit(bert_forward)(params, x))

    assert out.shape == (2, 8, HIDDEN) and out.dtype == jnp.float32
    assert bool(jnp.all(jnp.isfinite(out)))
    print("KERNEL_OK")
</pallas_src>

<mosaic_0001>
module attributes {stable_mosaic.version = 11 : i64} {
  func.func @_bert_stack_kernel(%arg0: i32, %arg1: memref<16x32xf32, #tpu.memory_space<vmem>>, %arg2: memref<1x32xf32, #tpu.memory_space<vmem>>, %arg3: memref<1x32xf32, #tpu.memory_space<vmem>>, %arg4: memref<1x4x32x8xbf16, #tpu.memory_space<vmem>>, %arg5: memref<1x4x32x8xbf16, #tpu.memory_space<vmem>>, %arg6: memref<1x4x32x8xbf16, #tpu.memory_space<vmem>>, %arg7: memref<1x4x1x8xf32, #tpu.memory_space<vmem>>, %arg8: memref<1x4x1x8xf32, #tpu.memory_space<vmem>>, %arg9: memref<1x4x1x8xf32, #tpu.memory_space<vmem>>, %arg10: memref<1x32x32xbf16, #tpu.memory_space<vmem>>, %arg11: memref<1x1x32xf32, #tpu.memory_space<vmem>>, %arg12: memref<1x1x32xf32, #tpu.memory_space<vmem>>, %arg13: memref<1x1x32xf32, #tpu.memory_space<vmem>>, %arg14: memref<1x32x64xbf16, #tpu.memory_space<vmem>>, %arg15: memref<1x1x64xf32, #tpu.memory_space<vmem>>, %arg16: memref<1x64x32xbf16, #tpu.memory_space<vmem>>, %arg17: memref<1x1x32xf32, #tpu.memory_space<vmem>>, %arg18: memref<1x1x32xf32, #tpu.memory_space<vmem>>, %arg19: memref<1x1x32xf32, #tpu.memory_space<vmem>>, %arg20: memref<16x32xf32, #tpu.memory_space<vmem>>, %arg21: memref<16x32xf32, #tpu.memory_space<vmem>>, %arg22: memref<16x32xf32, #tpu.memory_space<vmem>>) attributes {dimension_semantics = [#tpu.dimension_semantics<arbitrary>], iteration_bounds = array<i64: 2>, scalar_prefetch = 0 : i64, scratch_operands = 2 : i64, tpu.core_type = #tpu.core_type<tc>, window_params = [{pipeline_mode = #tpu.pipeline_mode<synchronous>, transform_indices = @transform_0, window_bounds = array<i64: 16, 32>}, {pipeline_mode = #tpu.pipeline_mode<synchronous>, transform_indices = @transform_1, window_bounds = array<i64: 1, 32>}, {pipeline_mode = #tpu.pipeline_mode<synchronous>, transform_indices = @transform_2, window_bounds = array<i64: 1, 32>}, {transform_indices = @transform_3, window_bounds = array<i64: 1, 4, 32, 8>}, {transform_indices = @transform_4, window_bounds = array<i64: 1, 4, 32, 8>}, {transform_indices = @transform_5, window_bounds = array<i64: 1, 4, 32, 8>}, {transform_indices = @transform_6, window_bounds = array<i64: 1, 4, 1, 8>}, {transform_indices = @transform_7, window_bounds = array<i64: 1, 4, 1, 8>}, {transform_indices = @transform_8, window_bounds = array<i64: 1, 4, 1, 8>}, {transform_indices = @transform_9, window_bounds = array<i64: 1, 32, 32>}, {transform_indices = @transform_10, window_bounds = array<i64: 1, 1, 32>}, {transform_indices = @transform_11, window_bounds = array<i64: 1, 1, 32>}, {transform_indices = @transform_12, window_bounds = array<i64: 1, 1, 32>}, {transform_indices = @transform_13, window_bounds = array<i64: 1, 32, 64>}, {transform_indices = @transform_14, window_bounds = array<i64: 1, 1, 64>}, {transform_indices = @transform_15, window_bounds = array<i64: 1, 64, 32>}, {transform_indices = @transform_16, window_bounds = array<i64: 1, 1, 32>}, {transform_indices = @transform_17, window_bounds = array<i64: 1, 1, 32>}, {transform_indices = @transform_18, window_bounds = array<i64: 1, 1, 32>}, {pipeline_mode = #tpu.pipeline_mode<synchronous>, transform_indices = @transform_19, window_bounds = array<i64: 16, 32>}]} {
    %c0_i32 = arith.constant 0 : i32
    %0 = arith.cmpi eq, %arg0, %c0_i32 : i32
    %1 = arith.extui %0 : i1 to i32
    %c0_i32_0 = arith.constant 0 : i32
    %2 = arith.cmpi ne, %1, %c0_i32_0 : i32
    scf.if %2 {
      %c0_204 = arith.constant 0 : index
      %c0_205 = arith.constant 0 : index
      %343 = vector.load %arg1[%c0_204, %c0_205] : memref<16x32xf32, #tpu.memory_space<vmem>>, vector<16x32xf32>
      %c0_206 = arith.constant 0 : index
      %c0_207 = arith.constant 0 : index
      %344 = vector.load %arg2[%c0_206, %c0_207] : memref<1x32xf32, #tpu.memory_space<vmem>>, vector<1x32xf32>
      %c0_208 = arith.constant 0 : index
      %c0_209 = arith.constant 0 : index
      %345 = vector.load %arg3[%c0_208, %c0_209] : memref<1x32xf32, #tpu.memory_space<vmem>>, vector<1x32xf32>
      %cst_210 = arith.constant dense<0.000000e+00> : vector<16xf32>
      %346 = vector.multi_reduction <add>, %343, %cst_210 [1] : vector<16x32xf32> to vector<16xf32>
      %347 = vector.shape_cast %346 : vector<16xf32> to vector<16x1xf32>
      %cst_211 = arith.constant 3.200000e+01 : f32
      %348 = vector.broadcast %cst_211 : f32 to vector<16x1xf32>
      %349 = arith.divf %347, %348 : vector<16x1xf32>
      %350 = vector.broadcast %349 : vector<16x1xf32> to vector<16x32xf32>
      %351 = arith.subf %343, %350 : vector<16x32xf32>
      %352 = arith.mulf %351, %351 : vector<16x32xf32>
      %cst_212 = arith.constant dense<0.000000e+00> : vector<16xf32>
      %353 = vector.multi_reduction <add>, %352, %cst_212 [1] : vector<16x32xf32> to vector<16xf32>
      %354 = vector.shape_cast %353 : vector<16xf32> to vector<16x1xf32>
      %cst_213 = arith.constant 3.200000e+01 : f32
      %355 = vector.broadcast %cst_213 : f32 to vector<16x1xf32>
      %356 = arith.divf %354, %355 : vector<16x1xf32>
      %357 = vector.broadcast %349 : vector<16x1xf32> to vector<16x32xf32>
      %358 = arith.subf %343, %357 : vector<16x32xf32>
      %cst_214 = arith.constant 9.99999996E-13 : f32
      %359 = vector.broadcast %cst_214 : f32 to vector<16x1xf32>
      %360 = arith.addf %356, %359 : vector<16x1xf32>
      %361 = math.rsqrt %360 : vector<16x1xf32>
      %362 = vector.broadcast %361 : vector<16x1xf32> to vector<16x32xf32>
      %363 = arith.mulf %358, %362 : vector<16x32xf32>
      %364 = vector.broadcast %344 : vector<1x32xf32> to vector<16x32xf32>
      %365 = arith.mulf %363, %364 : vector<16x32xf32>
      %366 = vector.broadcast %345 : vector<1x32xf32> to vector<16x32xf32>
      %367 = arith.addf %365, %366 : vector<16x32xf32>
      %c0_215 = arith.constant 0 : index
      %c0_216 = arith.constant 0 : index
      %368 = vector.load %arg21[%c0_215, %c0_216] : memref<16x32xf32, #tpu.memory_space<vmem>>, vector<16x32xf32>
      tpu.vector_store %arg21[%c0_215, %c0_216], %367 {strides = array<i32>} : memref<16x32xf32, #tpu.memory_space<vmem>>, vector<16x32xf32>,
    } else {
    }
    %c0 = arith.constant 0 : index
    %c0_1 = arith.constant 0 : index
    %3 = vector.load %arg21[%c0, %c0_1] : memref<16x32xf32, #tpu.memory_space<vmem>>, vector<16x32xf32>
    %4 = arith.truncf %3 : vector<16x32xf32> to vector<16x32xbf16>
    %c0_2 = arith.constant 0 : index
    %c0_3 = arith.constant 0 : index
    %c0_4 = arith.constant 0 : index
    %c0_5 = arith.constant 0 : index
    %5 = vector.load %arg4[%c0_2, %c0_3, %c0_4, %c0_5] : memref<1x4x32x8xbf16, #tpu.memory_space<vmem>>, vector<1x1x32x8xbf16>
    %6 = vector.shape_cast %5 : vector<1x1x32x8xbf16> to vector<32x8xbf16>
    %cst = arith.constant dense<0.000000e+00> : vector<16x8xf32>
    %7 = tpu.matmul %4, %6, %cst {dimension_numbers = #tpu.dot_dimension_numbers<[1], [0], [0], [1], [0, 0, 1, 1], [], []>} : vector<16x32xbf16>, vector<32x8xbf16>, vector<16x8xf32> -> vector<16x8xf32>
    %c0_6 = arith.constant 0 : index
    %c0_7 = arith.constant 0 : index
    %c0_8 = arith.constant 0 : index
    %c0_9 = arith.constant 0 : index
    %8 = vector.load %arg7[%c0_6, %c0_7, %c0_8, %c0_9] : memref<1x4x1x8xf32, #tpu.memory_space<vmem>>, vector<1x1x1x8xf32>
    %9 = vector.shape_cast %8 : vector<1x1x1x8xf32> to vector<1x8xf32>
    %10 = vector.broadcast %9 : vector<1x8xf32> to vector<16x8xf32>
    %11 = arith.addf %7, %10 : vector<16x8xf32>
    %c0_10 = arith.constant 0 : index
    %c0_11 = arith.constant 0 : index
    %c0_12 = arith.constant 0 : index
    %c0_13 = arith.constant 0 : index
    %12 = vector.load %arg5[%c0_10, %c0_11, %c0_12, %c0_13] : memref<1x4x32x8xbf16, #tpu.memory_space<vmem>>, vector<1x1x32x8xbf16>
    %13 = vector.shape_cast %12 : vector<1x1x32x8xbf16> to vector<32x8xbf16>
    %cst_14 = arith.constant dense<0.000000e+00> : vector<16x8xf32>
    %14 = tpu.matmul %4, %13, %cst_14 {dimension_numbers = #tpu.dot_dimension_numbers<[1], [0], [0], [1], [0, 0, 1, 1], [], []>} : vector<16x32xbf16>, vector<32x8xbf16>, vector<16x8xf32> -> vector<16x8xf32>
    %c0_15 = arith.constant 0 : index
    %c0_16 = arith.constant 0 : index
    %c0_17 = arith.constant 0 : index
    %c0_18 = arith.constant 0 : index
    %15 = vector.load %arg8[%c0_15, %c0_16, %c0_17, %c0_18] : memref<1x4x1x8xf32, #tpu.memory_space<vmem>>, vector<1x1x1x8xf32>
    %16 = vector.shape_cast %15 : vector<1x1x1x8xf32> to vector<1x8xf32>
    %17 = vector.broadcast %16 : vector<1x8xf32> to vector<16x8xf32>
    %18 = arith.addf %14, %17 : vector<16x8xf32>
    %c0_19 = arith.constant 0 : index
    %c0_20 = arith.constant 0 : index
    %c0_21 = arith.constant 0 : index
    %c0_22 = arith.constant 0 : index
    %19 = vector.load %arg6[%c0_19, %c0_20, %c0_21, %c0_22] : memref<1x4x32x8xbf16, #tpu.memory_space<vmem>>, vector<1x1x32x8xbf16>
    %20 = vector.shape_cast %19 : vector<1x1x32x8xbf16> to vector<32x8xbf16>
    %cst_23 = arith.constant dense<0.000000e+00> : vector<16x8xf32>
    %21 = tpu.matmul %4, %20, %cst_23 {dimension_numbers = #tpu.dot_dimension_numbers<[1], [0], [0], [1], [0, 0, 1, 1], [], []>} : vector<16x32xbf16>, vector<32x8xbf16>, vector<16x8xf32> -> vector<16x8xf32>
    %c0_24 = arith.constant 0 : index
    %c0_25 = arith.constant 0 : index
    %c0_26 = arith.constant 0 : index
    %c0_27 = arith.constant 0 : index
    %22 = vector.load %arg9[%c0_24, %c0_25, %c0_26, %c0_27] : memref<1x4x1x8xf32, #tpu.memory_space<vmem>>, vector<1x1x1x8xf32>
    %23 = vector.shape_cast %22 : vector<1x1x1x8xf32> to vector<1x8xf32>
    %24 = vector.broadcast %23 : vector<1x8xf32> to vector<16x8xf32>
    %25 = arith.addf %21, %24 : vector<16x8xf32>
    %26 = vector.extract_strided_slice %11 {offsets = [0, 0], sizes = [8, 8], strides = [1, 1]} : vector<16x8xf32> to vector<8x8xf32>
    %27 = arith.truncf %26 : vector<8x8xf32> to vector<8x8xbf16>
    %28 = vector.extract_strided_slice %18 {offsets = [0, 0], sizes = [8, 8], strides = [1, 1]} : vector<16x8xf32> to vector<8x8xf32>
    %29 = arith.truncf %28 : vector<8x8xf32> to vector<8x8xbf16>
    %30 = vector.extract_strided_slice %25 {offsets = [0, 0], sizes = [8, 8], strides = [1, 1]} : vector<16x8xf32> to vector<8x8xf32>
    %31 = arith.truncf %30 : vector<8x8xf32> to vector<8x8xbf16>
    %cst_28 = arith.constant dense<0.000000e+00> : vector<8x8xf32>
    %32 = tpu.matmul %27, %29, %cst_28 {dimension_numbers = #tpu.dot_dimension_numbers<[1], [1], [0], [0], [0, 0, 1, 0], [], []>} : vector<8x8xbf16>, vector<8x8xbf16>, vector<8x8xf32> -> vector<8x8xf32>
    %cst_29 = arith.constant dense<0xFF800000> : vector<8xf32>
    %33 = vector.multi_reduction <maximumf>, %32, %cst_29 [1] : vector<8x8xf32> to vector<8xf32>
    %34 = vector.shape_cast %33 : vector<8xf32> to vector<8x1xf32>
    %35 = vector.broadcast %34 : vector<8x1xf32> to vector<8x8xf32>
    %36 = arith.subf %32, %35 : vector<8x8xf32>
    %37 = math.exp %36 : vector<8x8xf32>
    %cst_30 = arith.constant dense<0.000000e+00> : vector<8xf32>
    %38 = vector.multi_reduction <add>, %37, %cst_30 [1] : vector<8x8xf32> to vector<8xf32>
    %39 = vector.shape_cast %38 : vector<8xf32> to vector<8x1xf32>
    %40 = tpu.reciprocal %39 {approx = true} : vector<8x1xf32> -> vector<8x1xf32>
    %41 = vector.broadcast %40 : vector<8x1xf32> to vector<8x8xf32>
    %42 = arith.mulf %37, %41 : vector<8x8xf32>
    %43 = arith.truncf %42 : vector<8x8xf32> to vector<8x8xbf16>
    %cst_31 = arith.constant dense<0.000000e+00> : vector<8x8xf32>
    %44 = tpu.matmul %43, %31, %cst_31 {dimension_numbers = #tpu.dot_dimension_numbers<[1], [0], [0], [1], [0, 0, 1, 1], [], []>} : vector<8x8xbf16>, vector<8x8xbf16>, vector<8x8xf32> -> vector<8x8xf32>
    %c0_32 = arith.constant 0 : index
    %c0_33 = arith.constant 0 : index
    %45 = vector.load %arg22[%c0_32, %c0_33] : memref<16x32xf32, #tpu.memory_space<vmem>>, vector<8x8xf32>
    tpu.vector_store %arg22[%c0_32, %c0_33], %44 {strides = array<i32>} : memref<16x32xf32, #tpu.memory_space<vmem>>, vector<8x8xf32>,
    %46 = vector.extract_strided_slice %11 {offsets = [8, 0], sizes = [8, 8], strides = [1, 1]} : vector<16x8xf32> to vector<8x8xf32>
    %47 = arith.truncf %46 : vector<8x8xf32> to vector<8x8xbf16>
    %48 = vector.extract_strided_slice %18 {offsets = [8, 0], sizes = [8, 8], strides = [1, 1]} : vector<16x8xf32> to vector<8x8xf32>
    %49 = arith.truncf %48 : vector<8x8xf32> to vector<8x8xbf16>
    %50 = vector.extract_strided_slice %25 {offsets = [8, 0], sizes = [8, 8], strides = [1, 1]} : vector<16x8xf32> to vector<8x8xf32>
    %51 = arith.truncf %50 : vector<8x8xf32> to vector<8x8xbf16>
    %cst_34 = arith.constant dense<0.000000e+00> : vector<8x8xf32>
    %52 = tpu.matmul %47, %49, %cst_34 {dimension_numbers = #tpu.dot_dimension_numbers<[1], [1], [0], [0], [0, 0, 1, 0], [], []>} : vector<8x8xbf16>, vector<8x8xbf16>, vector<8x8xf32> -> vector<8x8xf32>
    %cst_35 = arith.constant dense<0xFF800000> : vector<8xf32>
    %53 = vector.multi_reduction <maximumf>, %52, %cst_35 [1] : vector<8x8xf32> to vector<8xf32>
    %54 = vector.shape_cast %53 : vector<8xf32> to vector<8x1xf32>
    %55 = vector.broadcast %54 : vector<8x1xf32> to vector<8x8xf32>
    %56 = arith.subf %52, %55 : vector<8x8xf32>
    %57 = math.exp %56 : vector<8x8xf32>
    %cst_36 = arith.constant dense<0.000000e+00> : vector<8xf32>
    %58 = vector.multi_reduction <add>, %57, %cst_36 [1] : vector<8x8xf32> to vector<8xf32>
    %59 = vector.shape_cast %58 : vector<8xf32> to vector<8x1xf32>
    %60 = tpu.reciprocal %59 {approx = true} : vector<8x1xf32> -> vector<8x1xf32>
    %61 = vector.broadcast %60 : vector<8x1xf32> to vector<8x8xf32>
    %62 = arith.mulf %57, %61 : vector<8x8xf32>
    %63 = arith.truncf %62 : vector<8x8xf32> to vector<8x8xbf16>
    %cst_37 = arith.constant dense<0.000000e+00> : vector<8x8xf32>
    %64 = tpu.matmul %63, %51, %cst_37 {dimension_numbers = #tpu.dot_dimension_numbers<[1], [0], [0], [1], [0, 0, 1, 1], [], []>} : vector<8x8xbf16>, vector<8x8xbf16>, vector<8x8xf32> -> vector<8x8xf32>
    %c8 = arith.constant 8 : index
    %c0_38 = arith.constant 0 : index
    %65 = vector.load %arg22[%c8, %c0_38] : memref<16x32xf32, #tpu.memory_space<vmem>>, vector<8x8xf32>
    tpu.vector_store %arg22[%c8, %c0_38], %64 {strides = array<i32>} : memref<16x32xf32, #tpu.memory_space<vmem>>, vector<8x8xf32>,
    %c0_39 = arith.constant 0 : index
    %c1 = arith.constant 1 : index
    %c0_40 = arith.constant 0 : index
    %c0_41 = arith.constant 0 : index
    %66 = vector.load %arg4[%c0_39, %c1, %c0_40, %c0_41] : memref<1x4x32x8xbf16, #tpu.memory_space<vmem>>, vector<1x1x32x8xbf16>
    %67 = vector.shape_cast %66 : vector<1x1x32x8xbf16> to vector<32x8xbf16>
    %cst_42 = arith.constant dense<0.000000e+00> : vector<16x8xf32>
    %68 = tpu.matmul %4, %67, %cst_42 {dimension_numbers = #tpu.dot_dimension_numbers<[1], [0], [0], [1], [0, 0, 1, 1], [], []>} : vector<16x32xbf16>, vector<32x8xbf16>, vector<16x8xf32> -> vector<16x8xf32>
    %c0_43 = arith.constant 0 : index
    %c1_44 = arith.constant 1 : index
    %c0_45 = arith.constant 0 : index
    %c0_46 = arith.constant 0 : index
    %69 = vector.load %arg7[%c0_43, %c1_44, %c0_45, %c0_46] : memref<1x4x1x8xf32, #tpu.memory_space<vmem>>, vector<1x1x1x8xf32>
    %70 = vector.shape_cast %69 : vector<1x1x1x8xf32> to vector<1x8xf32>
    %71 = vector.broadcast %70 : vector<1x8xf32> to vector<16x8xf32>
    %72 = arith.addf %68, %71 : vector<16x8xf32>
    %c0_47 = arith.constant 0 : index
    %c1_48 = arith.constant 1 : index
    %c0_49 = arith.constant 0 : index
    %c0_50 = arith.constant 0 : index
    %73 = vector.load %arg5[%c0_47, %c1_48, %c0_49, %c0_50] : memref<1x4x32x8xbf16, #tpu.memory_space<vmem>>, vector<1x1x32x8xbf16>
    %74 = vector.shape_cast %73 : vector<1x1x32x8xbf16> to vector<32x8xbf16>
    %cst_51 = arith.constant dense<0.000000e+00> : vector<16x8xf32>
    %75 = tpu.matmul %4, %74, %cst_51 {dimension_numbers = #tpu.dot_dimension_numbers<[1], [0], [0], [1], [0, 0, 1, 1], [], []>} : vector<16x32xbf16>, vector<32x8xbf16>, vector<16x8xf32> -> vector<16x8xf32>
    %c0_52 = arith.constant 0 : index
    %c1_53 = arith.constant 1 : index
    %c0_54 = arith.constant 0 : index
    %c0_55 = arith.constant 0 : index
    %76 = vector.load %arg8[%c0_52, %c1_53, %c0_54, %c0_55] : memref<1x4x1x8xf32, #tpu.memory_space<vmem>>, vector<1x1x1x8xf32>
    %77 = vector.shape_cast %76 : vector<1x1x1x8xf32> to vector<1x8xf32>
    %78 = vector.broadcast %77 : vector<1x8xf32> to vector<16x8xf32>
    %79 = arith.addf %75, %78 : vector<16x8xf32>
    %c0_56 = arith.constant 0 : index
    %c1_57 = arith.constant 1 : index
    %c0_58 = arith.constant 0 : index
    %c0_59 = arith.constant 0 : index
    %80 = vector.load %arg6[%c0_56, %c1_57, %c0_58, %c0_59] : memref<1x4x32x8xbf16, #tpu.memory_space<vmem>>, vector<1x1x32x8xbf16>
    %81 = vector.shape_cast %80 : vector<1x1x32x8xbf16> to vector<32x8xbf16>
    %cst_60 = arith.constant dense<0.000000e+00> : vector<16x8xf32>
    %82 = tpu.matmul %4, %81, %cst_60 {dimension_numbers = #tpu.dot_dimension_numbers<[1], [0], [0], [1], [0, 0, 1, 1], [], []>} : vector<16x32xbf16>, vector<32x8xbf16>, vector<16x8xf32> -> vector<16x8xf32>
    %c0_61 = arith.constant 0 : index
    %c1_62 = arith.constant 1 : index
    %c0_63 = arith.constant 0 : index
    %c0_64 = arith.constant 0 : index
    %83 = vector.load %arg9[%c0_61, %c1_62, %c0_63, %c0_64] : memref<1x4x1x8xf32, #tpu.memory_space<vmem>>, vector<1x1x1x8xf32>
    %84 = vector.shape_cast %83 : vector<1x1x1x8xf32> to vector<1x8xf32>
    %85 = vector.broadcast %84 : vector<1x8xf32> to vector<16x8xf32>
    %86 = arith.addf %82, %85 : vector<16x8xf32>
    %87 = vector.extract_strided_slice %72 {offsets = [0, 0], sizes = [8, 8], strides = [1, 1]} : vector<16x8xf32> to vector<8x8xf32>
    %88 = arith.truncf %87 : vector<8x8xf32> to vector<8x8xbf16>
    %89 = vector.extract_strided_slice %79 {offsets = [0, 0], sizes = [8, 8], strides = [1, 1]} : vector<16x8xf32> to vector<8x8xf32>
    %90 = arith.truncf %89 : vector<8x8xf32> to vector<8x8xbf16>
    %91 = vector.extract_strided_slice %86 {offsets = [0, 0], sizes = [8, 8], strides = [1, 1]} : vector<16x8xf32> to vector<8x8xf32>
    %92 = arith.truncf %91 : vector<8x8xf32> to vector<8x8xbf16>
    %cst_65 = arith.constant dense<0.000000e+00> : vector<8x8xf32>
    %93 = tpu.matmul %88, %90, %cst_65 {dimension_numbers = #tpu.dot_dimension_numbers<[1], [1], [0], [0], [0, 0, 1, 0], [], []>} : vector<8x8xbf16>, vector<8x8xbf16>, vector<8x8xf32> -> vector<8x8xf32>
    %cst_66 = arith.constant dense<0xFF800000> : vector<8xf32>
    %94 = vector.multi_reduction <maximumf>, %93, %cst_66 [1] : vector<8x8xf32> to vector<8xf32>
    %95 = vector.shape_cast %94 : vector<8xf32> to vector<8x1xf32>
    %96 = vector.broadcast %95 : vector<8x1xf32> to vector<8x8xf32>
    %97 = arith.subf %93, %96 : vector<8x8xf32>
    %98 = math.exp %97 : vector<8x8xf32>
    %cst_67 = arith.constant dense<0.000000e+00> : vector<8xf32>
    %99 = vector.multi_reduction <add>, %98, %cst_67 [1] : vector<8x8xf32> to vector<8xf32>
    %100 = vector.shape_cast %99 : vector<8xf32> to vector<8x1xf32>
    %101 = tpu.reciprocal %100 {approx = true} : vector<8x1xf32> -> vector<8x1xf32>
    %102 = vector.broadcast %101 : vector<8x1xf32> to vector<8x8xf32>
    %103 = arith.mulf %98, %102 : vector<8x8xf32>
    %104 = arith.truncf %103 : vector<8x8xf32> to vector<8x8xbf16>
    %cst_68 = arith.constant dense<0.000000e+00> : vector<8x8xf32>
    %105 = tpu.matmul %104, %92, %cst_68 {dimension_numbers = #tpu.dot_dimension_numbers<[1], [0], [0], [1], [0, 0, 1, 1], [], []>} : vector<8x8xbf16>, vector<8x8xbf16>, vector<8x8xf32> -> vector<8x8xf32>
    %c0_69 = arith.constant 0 : index
    %c8_70 = arith.constant 8 : index
    %106 = vector.load %arg22[%c0_69, %c8_70] : memref<16x32xf32, #tpu.memory_space<vmem>>, vector<8x8xf32>
    tpu.vector_store %arg22[%c0_69, %c8_70], %105 {strides = array<i32>} : memref<16x32xf32, #tpu.memory_space<vmem>>, vector<8x8xf32>,
    %107 = vector.extract_strided_slice %72 {offsets = [8, 0], sizes = [8, 8], strides = [1, 1]} : vector<16x8xf32> to vector<8x8xf32>
    %108 = arith.truncf %107 : vector<8x8xf32> to vector<8x8xbf16>
    %109 = vector.extract_strided_slice %79 {offsets = [8, 0], sizes = [8, 8], strides = [1, 1]} : vector<16x8xf32> to vector<8x8xf32>
    %110 = arith.truncf %109 : vector<8x8xf32> to vector<8x8xbf16>
    %111 = vector.extract_strided_slice %86 {offsets = [8, 0], sizes = [8, 8], strides = [1, 1]} : vector<16x8xf32> to vector<8x8xf32>
    %112 = arith.truncf %111 : vector<8x8xf32> to vector<8x8xbf16>
    %cst_71 = arith.constant dense<0.000000e+00> : vector<8x8xf32>
    %113 = tpu.matmul %108, %110, %cst_71 {dimension_numbers = #tpu.dot_dimension_numbers<[1], [1], [0], [0], [0, 0, 1, 0], [], []>} : vector<8x8xbf16>, vector<8x8xbf16>, vector<8x8xf32> -> vector<8x8xf32>
    %cst_72 = arith.constant dense<0xFF800000> : vector<8xf32>
    %114 = vector.multi_reduction <maximumf>, %113, %cst_72 [1] : vector<8x8xf32> to vector<8xf32>
    %115 = vector.shape_cast %114 : vector<8xf32> to vector<8x1xf32>
    %116 = vector.broadcast %115 : vector<8x1xf32> to vector<8x8xf32>
    %117 = arith.subf %113, %116 : vector<8x8xf32>
    %118 = math.exp %117 : vector<8x8xf32>
    %cst_73 = arith.constant dense<0.000000e+00> : vector<8xf32>
    %119 = vector.multi_reduction <add>, %118, %cst_73 [1] : vector<8x8xf32> to vector<8xf32>
    %120 = vector.shape_cast %119 : vector<8xf32> to vector<8x1xf32>
    %121 = tpu.reciprocal %120 {approx = true} : vector<8x1xf32> -> vector<8x1xf32>
    %122 = vector.broadcast %121 : vector<8x1xf32> to vector<8x8xf32>
    %123 = arith.mulf %118, %122 : vector<8x8xf32>
    %124 = arith.truncf %123 : vector<8x8xf32> to vector<8x8xbf16>
    %cst_74 = arith.constant dense<0.000000e+00> : vector<8x8xf32>
    %125 = tpu.matmul %124, %112, %cst_74 {dimension_numbers = #tpu.dot_dimension_numbers<[1], [0], [0], [1], [0, 0, 1, 1], [], []>} : vector<8x8xbf16>, vector<8x8xbf16>, vector<8x8xf32> -> vector<8x8xf32>
    %c8_75 = arith.constant 8 : index
    %c8_76 = arith.constant 8 : index
    %126 = vector.load %arg22[%c8_75, %c8_76] : memref<16x32xf32, #tpu.memory_space<vmem>>, vector<8x8xf32>
    tpu.vector_store %arg22[%c8_75, %c8_76], %125 {strides = array<i32>} : memref<16x32xf32, #tpu.memory_space<vmem>>, vector<8x8xf32>,
    %c0_77 = arith.constant 0 : index
    %c2 = arith.constant 2 : index
    %c0_78 = arith.constant 0 : index
    %c0_79 = arith.constant 0 : index
    %127 = vector.load %arg4[%c0_77, %c2, %c0_78, %c0_79] : memref<1x4x32x8xbf16, #tpu.memory_space<vmem>>, vector<1x1x32x8xbf16>
    %128 = vector.shape_cast %127 : vector<1x1x32x8xbf16> to vector<32x8xbf16>
    %cst_80 = arith.constant dense<0.000000e+00> : vector<16x8xf32>
    %129 = tpu.matmul %4, %128, %cst_80 {dimension_numbers = #tpu.dot_dimension_numbers<[1], [0], [0], [1], [0, 0, 1, 1], [], []>} : vector<16x32xbf16>, vector<32x8xbf16>, vector<16x8xf32> -> vector<16x8xf32>
    %c0_81 = arith.constant 0 : index
    %c2_82 = arith.constant 2 : index
    %c0_83 = arith.constant 0 : index
    %c0_84 = arith.constant 0 : index
    %130 = vector.load %arg7[%c0_81, %c2_82, %c0_83, %c0_84] : memref<1x4x1x8xf32, #tpu.memory_space<vmem>>, vector<1x1x1x8xf32>
    %131 = vector.shape_cast %130 : vector<1x1x1x8xf32> to vector<1x8xf32>
    %132 = vector.broadcast %131 : vector<1x8xf32> to vector<16x8xf32>
    %133 = arith.addf %129, %132 : vector<16x8xf32>
    %c0_85 = arith.constant 0 : index
    %c2_86 = arith.constant 2 : index
    %c0_87 = arith.constant 0 : index
    %c0_88 = arith.constant 0 : index
    %134 = vector.load %arg5[%c0_85, %c2_86, %c0_87, %c0_88] : memref<1x4x32x8xbf16, #tpu.memory_space<vmem>>, vector<1x1x32x8xbf16>
    %135 = vector.shape_cast %134 : vector<1x1x32x8xbf16> to vector<32x8xbf16>
    %cst_89 = arith.constant dense<0.000000e+00> : vector<16x8xf32>
    %136 = tpu.matmul %4, %135, %cst_89 {dimension_numbers = #tpu.dot_dimension_numbers<[1], [0], [0], [1], [0, 0, 1, 1], [], []>} : vector<16x32xbf16>, vector<32x8xbf16>, vector<16x8xf32> -> vector<16x8xf32>
    %c0_90 = arith.constant 0 : index
    %c2_91 = arith.constant 2 : index
    %c0_92 = arith.constant 0 : index
    %c0_93 = arith.constant 0 : index
    %137 = vector.load %arg8[%c0_90, %c2_91, %c0_92, %c0_93] : memref<1x4x1x8xf32, #tpu.memory_space<vmem>>, vector<1x1x1x8xf32>
    %138 = vector.shape_cast %137 : vector<1x1x1x8xf32> to vector<1x8xf32>
    %139 = vector.broadcast %138 : vector<1x8xf32> to vector<16x8xf32>
    %140 = arith.addf %136, %139 : vector<16x8xf32>
    %c0_94 = arith.constant 0 : index
    %c2_95 = arith.constant 2 : index
    %c0_96 = arith.constant 0 : index
    %c0_97 = arith.constant 0 : index
    %141 = vector.load %arg6[%c0_94, %c2_95, %c0_96, %c0_97] : memref<1x4x32x8xbf16, #tpu.memory_space<vmem>>, vector<1x1x32x8xbf16>
    %142 = vector.shape_cast %141 : vector<1x1x32x8xbf16> to vector<32x8xbf16>
    %cst_98 = arith.constant dense<0.000000e+00> : vector<16x8xf32>
    %143 = tpu.matmul %4, %142, %cst_98 {dimension_numbers = #tpu.dot_dimension_numbers<[1], [0], [0], [1], [0, 0, 1, 1], [], []>} : vector<16x32xbf16>, vector<32x8xbf16>, vector<16x8xf32> -> vector<16x8xf32>
    %c0_99 = arith.constant 0 : index
    %c2_100 = arith.constant 2 : index
    %c0_101 = arith.constant 0 : index
    %c0_102 = arith.constant 0 : index
    %144 = vector.load %arg9[%c0_99, %c2_100, %c0_101, %c0_102] : memref<1x4x1x8xf32, #tpu.memory_space<vmem>>, vector<1x1x1x8xf32>
    %145 = vector.shape_cast %144 : vector<1x1x1x8xf32> to vector<1x8xf32>
    %146 = vector.broadcast %145 : vector<1x8xf32> to vector<16x8xf32>
    %147 = arith.addf %143, %146 : vector<16x8xf32>
    %148 = vector.extract_strided_slice %133 {offsets = [0, 0], sizes = [8, 8], strides = [1, 1]} : vector<16x8xf32> to vector<8x8xf32>
    %149 = arith.truncf %148 : vector<8x8xf32> to vector<8x8xbf16>
    %150 = vector.extract_strided_slice %140 {offsets = [0, 0], sizes = [8, 8], strides = [1, 1]} : vector<16x8xf32> to vector<8x8xf32>
    %151 = arith.truncf %150 : vector<8x8xf32> to vector<8x8xbf16>
    %152 = vector.extract_strided_slice %147 {offsets = [0, 0], sizes = [8, 8], strides = [1, 1]} : vector<16x8xf32> to vector<8x8xf32>
    %153 = arith.truncf %152 : vector<8x8xf32> to vector<8x8xbf16>
    %cst_103 = arith.constant dense<0.000000e+00> : vector<8x8xf32>
    %154 = tpu.matmul %149, %151, %cst_103 {dimension_numbers = #tpu.dot_dimension_numbers<[1], [1], [0], [0], [0, 0, 1, 0], [], []>} : vector<8x8xbf16>, vector<8x8xbf16>, vector<8x8xf32> -> vector<8x8xf32>
    %cst_104 = arith.constant dense<0xFF800000> : vector<8xf32>
    %155 = vector.multi_reduction <maximumf>, %154, %cst_104 [1] : vector<8x8xf32> to vector<8xf32>
    %156 = vector.shape_cast %155 : vector<8xf32> to vector<8x1xf32>
    %157 = vector.broadcast %156 : vector<8x1xf32> to vector<8x8xf32>
    %158 = arith.subf %154, %157 : vector<8x8xf32>
    %159 = math.exp %158 : vector<8x8xf32>
    %cst_105 = arith.constant dense<0.000000e+00> : vector<8xf32>
    %160 = vector.multi_reduction <add>, %159, %cst_105 [1] : vector<8x8xf32> to vector<8xf32>
    %161 = vector.shape_cast %160 : vector<8xf32> to vector<8x1xf32>
    %162 = tpu.reciprocal %161 {approx = true} : vector<8x1xf32> -> vector<8x1xf32>
    %163 = vector.broadcast %162 : vector<8x1xf32> to vector<8x8xf32>
    %164 = arith.mulf %159, %163 : vector<8x8xf32>
    %165 = arith.truncf %164 : vector<8x8xf32> to vector<8x8xbf16>
    %cst_106 = arith.constant dense<0.000000e+00> : vector<8x8xf32>
    %166 = tpu.matmul %165, %153, %cst_106 {dimension_numbers = #tpu.dot_dimension_numbers<[1], [0], [0], [1], [0, 0, 1, 1], [], []>} : vector<8x8xbf16>, vector<8x8xbf16>, vector<8x8xf32> -> vector<8x8xf32>
    %c0_107 = arith.constant 0 : index
    %c16 = arith.constant 16 : index
    %167 = vector.load %arg22[%c0_107, %c16] : memref<16x32xf32, #tpu.memory_space<vmem>>, vector<8x8xf32>
    tpu.vector_store %arg22[%c0_107, %c16], %166 {strides = array<i32>} : memref<16x32xf32, #tpu.memory_space<vmem>>, vector<8x8xf32>,
    %168 = vector.extract_strided_slice %133 {offsets = [8, 0], sizes = [8, 8], strides = [1, 1]} : vector<16x8xf32> to vector<8x8xf32>
    %169 = arith.truncf %168 : vector<8x8xf32> to vector<8x8xbf16>
    %170 = vector.extract_strided_slice %140 {offsets = [8, 0], sizes = [8, 8], strides = [1, 1]} : vector<16x8xf32> to vector<8x8xf32>
    %171 = arith.truncf %170 : vector<8x8xf32> to vector<8x8xbf16>
    %172 = vector.extract_strided_slice %147 {offsets = [8, 0], sizes = [8, 8], strides = [1, 1]} : vector<16x8xf32> to vector<8x8xf32>
    %173 = arith.truncf %172 : vector<8x8xf32> to vector<8x8xbf16>
    %cst_108 = arith.constant dense<0.000000e+00> : vector<8x8xf32>
    %174 = tpu.matmul %169, %171, %cst_108 {dimension_numbers = #tpu.dot_dimension_numbers<[1], [1], [0], [0], [0, 0, 1, 0], [], []>} : vector<8x8xbf16>, vector<8x8xbf16>, vector<8x8xf32> -> vector<8x8xf32>
    %cst_109 = arith.constant dense<0xFF800000> : vector<8xf32>
    %175 = vector.multi_reduction <maximumf>, %174, %cst_109 [1] : vector<8x8xf32> to vector<8xf32>
    %176 = vector.shape_cast %175 : vector<8xf32> to vector<8x1xf32>
    %177 = vector.broadcast %176 : vector<8x1xf32> to vector<8x8xf32>
    %178 = arith.subf %174, %177 : vector<8x8xf32>
    %179 = math.exp %178 : vector<8x8xf32>
    %cst_110 = arith.constant dense<0.000000e+00> : vector<8xf32>
    %180 = vector.multi_reduction <add>, %179, %cst_110 [1] : vector<8x8xf32> to vector<8xf32>
    %181 = vector.shape_cast %180 : vector<8xf32> to vector<8x1xf32>
    %182 = tpu.reciprocal %181 {approx = true} : vector<8x1xf32> -> vector<8x1xf32>
    %183 = vector.broadcast %182 : vector<8x1xf32> to vector<8x8xf32>
    %184 = arith.mulf %179, %183 : vector<8x8xf32>
    %185 = arith.truncf %184 : vector<8x8xf32> to vector<8x8xbf16>
    %cst_111 = arith.constant dense<0.000000e+00> : vector<8x8xf32>
    %186 = tpu.matmul %185, %173, %cst_111 {dimension_numbers = #tpu.dot_dimension_numbers<[1], [0], [0], [1], [0, 0, 1, 1], [], []>} : vector<8x8xbf16>, vector<8x8xbf16>, vector<8x8xf32> -> vector<8x8xf32>
    %c8_112 = arith.constant 8 : index
    %c16_113 = arith.constant 16 : index
    %187 = vector.load %arg22[%c8_112, %c16_113] : memref<16x32xf32, #tpu.memory_space<vmem>>, vector<8x8xf32>
    tpu.vector_store %arg22[%c8_112, %c16_113], %186 {strides = array<i32>} : memref<16x32xf32, #tpu.memory_space<vmem>>, vector<8x8xf32>,
    %c0_114 = arith.constant 0 : index
    %c3 = arith.constant 3 : index
    %c0_115 = arith.constant 0 : index
    %c0_116 = arith.constant 0 : index
    %188 = vector.load %arg4[%c0_114, %c3, %c0_115, %c0_116] : memref<1x4x32x8xbf16, #tpu.memory_space<vmem>>, vector<1x1x32x8xbf16>
    %189 = vector.shape_cast %188 : vector<1x1x32x8xbf16> to vector<32x8xbf16>
    %cst_117 = arith.constant dense<0.000000e+00> : vector<16x8xf32>
    %190 = tpu.matmul %4, %189, %cst_117 {dimension_numbers = #tpu.dot_dimension_numbers<[1], [0], [0], [1], [0, 0, 1, 1], [], []>} : vector<16x32xbf16>, vector<32x8xbf16>, vector<16x8xf32> -> vector<16x8xf32>
    %c0_118 = arith.constant 0 : index
    %c3_119 = arith.constant 3 : index
    %c0_120 = arith.constant 0 : index
    %c0_121 = arith.constant 0 : index
    %191 = vector.load %arg7[%c0_118, %c3_119, %c0_120, %c0_121] : memref<1x4x1x8xf32, #tpu.memory_space<vmem>>, vector<1x1x1x8xf32>
    %192 = vector.shape_cast %191 : vector<1x1x1x8xf32> to vector<1x8xf32>
    %193 = vector.broadcast %192 : vector<1x8xf32> to vector<16x8xf32>
    %194 = arith.addf %190, %193 : vector<16x8xf32>
    %c0_122 = arith.constant 0 : index
    %c3_123 = arith.constant 3 : index
    %c0_124 = arith.constant 0 : index
    %c0_125 = arith.constant 0 : index
    %195 = vector.load %arg5[%c0_122, %c3_123, %c0_124, %c0_125] : memref<1x4x32x8xbf16, #tpu.memory_space<vmem>>, vector<1x1x32x8xbf16>
    %196 = vector.shape_cast %195 : vector<1x1x32x8xbf16> to vector<32x8xbf16>
    %cst_126 = arith.constant dense<0.000000e+00> : vector<16x8xf32>
    %197 = tpu.matmul %4, %196, %cst_126 {dimension_numbers = #tpu.dot_dimension_numbers<[1], [0], [0], [1], [0, 0, 1, 1], [], []>} : vector<16x32xbf16>, vector<32x8xbf16>, vector<16x8xf32> -> vector<16x8xf32>
    %c0_127 = arith.constant 0 : index
    %c3_128 = arith.constant 3 : index
    %c0_129 = arith.constant 0 : index
    %c0_130 = arith.constant 0 : index
    %198 = vector.load %arg8[%c0_127, %c3_128, %c0_129, %c0_130] : memref<1x4x1x8xf32, #tpu.memory_space<vmem>>, vector<1x1x1x8xf32>
    %199 = vector.shape_cast %198 : vector<1x1x1x8xf32> to vector<1x8xf32>
    %200 = vector.broadcast %199 : vector<1x8xf32> to vector<16x8xf32>
    %201 = arith.addf %197, %200 : vector<16x8xf32>
    %c0_131 = arith.constant 0 : index
    %c3_132 = arith.constant 3 : index
    %c0_133 = arith.constant 0 : index
    %c0_134 = arith.constant 0 : index
    %202 = vector.load %arg6[%c0_131, %c3_132, %c0_133, %c0_134] : memref<1x4x32x8xbf16, #tpu.memory_space<vmem>>, vector<1x1x32x8xbf16>
    %203 = vector.shape_cast %202 : vector<1x1x32x8xbf16> to vector<32x8xbf16>
    %cst_135 = arith.constant dense<0.000000e+00> : vector<16x8xf32>
    %204 = tpu.matmul %4, %203, %cst_135 {dimension_numbers = #tpu.dot_dimension_numbers<[1], [0], [0], [1], [0, 0, 1, 1], [], []>} : vector<16x32xbf16>, vector<32x8xbf16>, vector<16x8xf32> -> vector<16x8xf32>
    %c0_136 = arith.constant 0 : index
    %c3_137 = arith.constant 3 : index
    %c0_138 = arith.constant 0 : index
    %c0_139 = arith.constant 0 : index
    %205 = vector.load %arg9[%c0_136, %c3_137, %c0_138, %c0_139] : memref<1x4x1x8xf32, #tpu.memory_space<vmem>>, vector<1x1x1x8xf32>
    %206 = vector.shape_cast %205 : vector<1x1x1x8xf32> to vector<1x8xf32>
    %207 = vector.broadcast %206 : vector<1x8xf32> to vector<16x8xf32>
    %208 = arith.addf %204, %207 : vector<16x8xf32>
    %209 = vector.extract_strided_slice %194 {offsets = [0, 0], sizes = [8, 8], strides = [1, 1]} : vector<16x8xf32> to vector<8x8xf32>
    %210 = arith.truncf %209 : vector<8x8xf32> to vector<8x8xbf16>
    %211 = vector.extract_strided_slice %201 {offsets = [0, 0], sizes = [8, 8], strides = [1, 1]} : vector<16x8xf32> to vector<8x8xf32>
    %212 = arith.truncf %211 : vector<8x8xf32> to vector<8x8xbf16>
    %213 = vector.extract_strided_slice %208 {offsets = [0, 0], sizes = [8, 8], strides = [1, 1]} : vector<16x8xf32> to vector<8x8xf32>
    %214 = arith.truncf %213 : vector<8x8xf32> to vector<8x8xbf16>
    %cst_140 = arith.constant dense<0.000000e+00> : vector<8x8xf32>
    %215 = tpu.matmul %210, %212, %cst_140 {dimension_numbers = #tpu.dot_dimension_numbers<[1], [1], [0], [0], [0, 0, 1, 0], [], []>} : vector<8x8xbf16>, vector<8x8xbf16>, vector<8x8xf32> -> vector<8x8xf32>
    %cst_141 = arith.constant dense<0xFF800000> : vector<8xf32>
    %216 = vector.multi_reduction <maximumf>, %215, %cst_141 [1] : vector<8x8xf32> to vector<8xf32>
    %217 = vector.shape_cast %216 : vector<8xf32> to vector<8x1xf32>
    %218 = vector.broadcast %217 : vector<8x1xf32> to vector<8x8xf32>
    %219 = arith.subf %215, %218 : vector<8x8xf32>
    %220 = math.exp %219 : vector<8x8xf32>
    %cst_142 = arith.constant dense<0.000000e+00> : vector<8xf32>
    %221 = vector.multi_reduction <add>, %220, %cst_142 [1] : vector<8x8xf32> to vector<8xf32>
    %222 = vector.shape_cast %221 : vector<8xf32> to vector<8x1xf32>
    %223 = tpu.reciprocal %222 {approx = true} : vector<8x1xf32> -> vector<8x1xf32>
    %224 = vector.broadcast %223 : vector<8x1xf32> to vector<8x8xf32>
    %225 = arith.mulf %220, %224 : vector<8x8xf32>
    %226 = arith.truncf %225 : vector<8x8xf32> to vector<8x8xbf16>
    %cst_143 = arith.constant dense<0.000000e+00> : vector<8x8xf32>
    %227 = tpu.matmul %226, %214, %cst_143 {dimension_numbers = #tpu.dot_dimension_numbers<[1], [0], [0], [1], [0, 0, 1, 1], [], []>} : vector<8x8xbf16>, vector<8x8xbf16>, vector<8x8xf32> -> vector<8x8xf32>
    %c0_144 = arith.constant 0 : index
    %c24 = arith.constant 24 : index
    %228 = vector.load %arg22[%c0_144, %c24] : memref<16x32xf32, #tpu.memory_space<vmem>>, vector<8x8xf32>
    tpu.vector_store %arg22[%c0_144, %c24], %227 {strides = array<i32>} : memref<16x32xf32, #tpu.memory_space<vmem>>, vector<8x8xf32>,
    %229 = vector.extract_strided_slice %194 {offsets = [8, 0], sizes = [8, 8], strides = [1, 1]} : vector<16x8xf32> to vector<8x8xf32>
    %230 = arith.truncf %229 : vector<8x8xf32> to vector<8x8xbf16>
    %231 = vector.extract_strided_slice %201 {offsets = [8, 0], sizes = [8, 8], strides = [1, 1]} : vector<16x8xf32> to vector<8x8xf32>
    %232 = arith.truncf %231 : vector<8x8xf32> to vector<8x8xbf16>
    %233 = vector.extract_strided_slice %208 {offsets = [8, 0], sizes = [8, 8], strides = [1, 1]} : vector<16x8xf32> to vector<8x8xf32>
    %234 = arith.truncf %233 : vector<8x8xf32> to vector<8x8xbf16>
    %cst_145 = arith.constant dense<0.000000e+00> : vector<8x8xf32>
    %235 = tpu.matmul %230, %232, %cst_145 {dimension_numbers = #tpu.dot_dimension_numbers<[1], [1], [0], [0], [0, 0, 1, 0], [], []>} : vector<8x8xbf16>, vector<8x8xbf16>, vector<8x8xf32> -> vector<8x8xf32>
    %cst_146 = arith.constant dense<0xFF800000> : vector<8xf32>
    %236 = vector.multi_reduction <maximumf>, %235, %cst_146 [1] : vector<8x8xf32> to vector<8xf32>
    %237 = vector.shape_cast %236 : vector<8xf32> to vector<8x1xf32>
    %238 = vector.broadcast %237 : vector<8x1xf32> to vector<8x8xf32>
    %239 = arith.subf %235, %238 : vector<8x8xf32>
    %240 = math.exp %239 : vector<8x8xf32>
    %cst_147 = arith.constant dense<0.000000e+00> : vector<8xf32>
    %241 = vector.multi_reduction <add>, %240, %cst_147 [1] : vector<8x8xf32> to vector<8xf32>
    %242 = vector.shape_cast %241 : vector<8xf32> to vector<8x1xf32>
    %243 = tpu.reciprocal %242 {approx = true} : vector<8x1xf32> -> vector<8x1xf32>
    %244 = vector.broadcast %243 : vector<8x1xf32> to vector<8x8xf32>
    %245 = arith.mulf %240, %244 : vector<8x8xf32>
    %246 = arith.truncf %245 : vector<8x8xf32> to vector<8x8xbf16>
    %cst_148 = arith.constant dense<0.000000e+00> : vector<8x8xf32>
    %247 = tpu.matmul %246, %234, %cst_148 {dimension_numbers = #tpu.dot_dimension_numbers<[1], [0], [0], [1], [0, 0, 1, 1], [], []>} : vector<8x8xbf16>, vector<8x8xbf16>, vector<8x8xf32> -> vector<8x8xf32>
    %c8_149 = arith.constant 8 : index
    %c24_150 = arith.constant 24 : index
    %248 = vector.load %arg22[%c8_149, %c24_150] : memref<16x32xf32, #tpu.memory_space<vmem>>, vector<8x8xf32>
    tpu.vector_store %arg22[%c8_149, %c24_150], %247 {strides = array<i32>} : memref<16x32xf32, #tpu.memory_space<vmem>>, vector<8x8xf32>,
    %c0_151 = arith.constant 0 : index
    %c0_152 = arith.constant 0 : index
    %249 = vector.load %arg22[%c0_151, %c0_152] : memref<16x32xf32, #tpu.memory_space<vmem>>, vector<16x32xf32>
    %250 = arith.truncf %249 : vector<16x32xf32> to vector<16x32xbf16>
    %c0_153 = arith.constant 0 : index
    %c0_154 = arith.constant 0 : index
    %c0_155 = arith.constant 0 : index
    %251 = vector.load %arg10[%c0_153, %c0_154, %c0_155] : memref<1x32x32xbf16, #tpu.memory_space<vmem>>, vector<1x32x32xbf16>
    %252 = vector.shape_cast %251 : vector<1x32x32xbf16> to vector<32x32xbf16>
    %cst_156 = arith.constant dense<0.000000e+00> : vector<16x32xf32>
    %253 = tpu.matmul %250, %252, %cst_156 {dimension_numbers = #tpu.dot_dimension_numbers<[1], [0], [0], [1], [0, 0, 1, 1], [], []>} : vector<16x32xbf16>, vector<32x32xbf16>, vector<16x32xf32> -> vector<16x32xf32>
    %c0_157 = arith.constant 0 : index
    %c0_158 = arith.constant 0 : index
    %c0_159 = arith.constant 0 : index
    %254 = vector.load %arg11[%c0_157, %c0_158, %c0_159] : memref<1x1x32xf32, #tpu.memory_space<vmem>>, vector<1x1x32xf32>
    %255 = vector.shape_cast %254 : vector<1x1x32xf32> to vector<1x32xf32>
    %256 = vector.broadcast %255 : vector<1x32xf32> to vector<16x32xf32>
    %257 = arith.addf %253, %256 : vector<16x32xf32>
    %258 = arith.addf %257, %3 : vector<16x32xf32>
    %c0_160 = arith.constant 0 : index
    %c0_161 = arith.constant 0 : index
    %c0_162 = arith.constant 0 : index
    %259 = vector.load %arg12[%c0_160, %c0_161, %c0_162] : memref<1x1x32xf32, #tpu.memory_space<vmem>>, vector<1x1x32xf32>
    %260 = vector.shape_cast %259 : vector<1x1x32xf32> to vector<1x32xf32>
    %c0_163 = arith.constant 0 : index
    %c0_164 = arith.constant 0 : index
    %c0_165 = arith.constant 0 : index
    %261 = vector.load %arg13[%c0_163, %c0_164, %c0_165] : memref<1x1x32xf32, #tpu.memory_space<vmem>>, vector<1x1x32xf32>
    %262 = vector.shape_cast %261 : vector<1x1x32xf32> to vector<1x32xf32>
    %cst_166 = arith.constant dense<0.000000e+00> : vector<16xf32>
    %263 = vector.multi_reduction <add>, %258, %cst_166 [1] : vector<16x32xf32> to vector<16xf32>
    %264 = vector.shape_cast %263 : vector<16xf32> to vector<16x1xf32>
    %cst_167 = arith.constant 3.200000e+01 : f32
    %265 = vector.broadcast %cst_167 : f32 to vector<16x1xf32>
    %266 = arith.divf %264, %265 : vector<16x1xf32>
    %267 = vector.broadcast %266 : vector<16x1xf32> to vector<16x32xf32>
    %268 = arith.subf %258, %267 : vector<16x32xf32>
    %269 = arith.mulf %268, %268 : vector<16x32xf32>
    %cst_168 = arith.constant dense<0.000000e+00> : vector<16xf32>
    %270 = vector.multi_reduction <add>, %269, %cst_168 [1] : vector<16x32xf32> to vector<16xf32>
    %271 = vector.shape_cast %270 : vector<16xf32> to vector<16x1xf32>
    %cst_169 = arith.constant 3.200000e+01 : f32
    %272 = vector.broadcast %cst_169 : f32 to vector<16x1xf32>
    %273 = arith.divf %271, %272 : vector<16x1xf32>
    %274 = vector.broadcast %266 : vector<16x1xf32> to vector<16x32xf32>
    %275 = arith.subf %258, %274 : vector<16x32xf32>
    %cst_170 = arith.constant 9.99999996E-13 : f32
    %276 = vector.broadcast %cst_170 : f32 to vector<16x1xf32>
    %277 = arith.addf %273, %276 : vector<16x1xf32>
    %278 = math.rsqrt %277 : vector<16x1xf32>
    %279 = vector.broadcast %278 : vector<16x1xf32> to vector<16x32xf32>
    %280 = arith.mulf %275, %279 : vector<16x32xf32>
    %281 = vector.broadcast %260 : vector<1x32xf32> to vector<16x32xf32>
    %282 = arith.mulf %280, %281 : vector<16x32xf32>
    %283 = vector.broadcast %262 : vector<1x32xf32> to vector<16x32xf32>
    %284 = arith.addf %282, %283 : vector<16x32xf32>
    %285 = arith.truncf %284 : vector<16x32xf32> to vector<16x32xbf16>
    %c0_171 = arith.constant 0 : index
    %c0_172 = arith.constant 0 : index
    %c0_173 = arith.constant 0 : index
    %286 = vector.load %arg14[%c0_171, %c0_172, %c0_173] : memref<1x32x64xbf16, #tpu.memory_space<vmem>>, vector<1x32x64xbf16>
    %287 = vector.shape_cast %286 : vector<1x32x64xbf16> to vector<32x64xbf16>
    %cst_174 = arith.constant dense<0.000000e+00> : vector<16x64xf32>
    %288 = tpu.matmul %285, %287, %cst_174 {dimension_numbers = #tpu.dot_dimension_numbers<[1], [0], [0], [1], [0, 0, 1, 1], [], []>} : vector<16x32xbf16>, vector<32x64xbf16>, vector<16x64xf32> -> vector<16x64xf32>
    %c0_175 = arith.constant 0 : index
    %c0_176 = arith.constant 0 : index
    %c0_177 = arith.constant 0 : index
    %289 = vector.load %arg15[%c0_175, %c0_176, %c0_177] : memref<1x1x64xf32, #tpu.memory_space<vmem>>, vector<1x1x64xf32>
    %290 = vector.shape_cast %289 : vector<1x1x64xf32> to vector<1x64xf32>
    %291 = vector.broadcast %290 : vector<1x64xf32> to vector<16x64xf32>
    %292 = arith.addf %288, %291 : vector<16x64xf32>
    %293 = arith.mulf %292, %292 : vector<16x64xf32>
    %294 = arith.mulf %292, %293 : vector<16x64xf32>
    %cst_178 = arith.constant 4.471500e-02 : f32
    %295 = vector.broadcast %cst_178 : f32 to vector<16x64xf32>
    %296 = arith.mulf %295, %294 : vector<16x64xf32>
    %297 = arith.addf %292, %296 : vector<16x64xf32>
    %cst_179 = arith.constant 0.797884583 : f32
    %298 = vector.broadcast %cst_179 : f32 to vector<16x64xf32>
    %299 = arith.mulf %298, %297 : vector<16x64xf32>
    %300 = math.tanh %299 : vector<16x64xf32>
    %cst_180 = arith.constant 1.000000e+00 : f32
    %301 = vector.broadcast %cst_180 : f32 to vector<16x64xf32>
    %302 = arith.addf %301, %300 : vector<16x64xf32>
    %cst_181 = arith.constant 5.000000e-01 : f32
    %303 = vector.broadcast %cst_181 : f32 to vector<16x64xf32>
    %304 = arith.mulf %303, %302 : vector<16x64xf32>
    %305 = arith.mulf %292, %304 : vector<16x64xf32>
    %306 = arith.truncf %305 : vector<16x64xf32> to vector<16x64xbf16>
    %c0_182 = arith.constant 0 : index
    %c0_183 = arith.constant 0 : index
    %c0_184 = arith.constant 0 : index
    %307 = vector.load %arg16[%c0_182, %c0_183, %c0_184] : memref<1x64x32xbf16, #tpu.memory_space<vmem>>, vector<1x64x32xbf16>
    %308 = vector.shape_cast %307 : vector<1x64x32xbf16> to vector<64x32xbf16>
    %cst_185 = arith.constant dense<0.000000e+00> : vector<16x32xf32>
    %309 = tpu.matmul %306, %308, %cst_185 {dimension_numbers = #tpu.dot_dimension_numbers<[1], [0], [0], [1], [0, 0, 1, 1], [], []>} : vector<16x64xbf16>, vector<64x32xbf16>, vector<16x32xf32> -> vector<16x32xf32>
    %c0_186 = arith.constant 0 : index
    %c0_187 = arith.constant 0 : index
    %c0_188 = arith.constant 0 : index
    %310 = vector.load %arg17[%c0_186, %c0_187, %c0_188] : memref<1x1x32xf32, #tpu.memory_space<vmem>>, vector<1x1x32xf32>
    %311 = vector.shape_cast %310 : vector<1x1x32xf32> to vector<1x32xf32>
    %312 = vector.broadcast %311 : vector<1x32xf32> to vector<16x32xf32>
    %313 = arith.addf %309, %312 : vector<16x32xf32>
    %314 = arith.addf %313, %284 : vector<16x32xf32>
    %c0_189 = arith.constant 0 : index
    %c0_190 = arith.constant 0 : index
    %c0_191 = arith.constant 0 : index
    %315 = vector.load %arg18[%c0_189, %c0_190, %c0_191] : memref<1x1x32xf32, #tpu.memory_space<vmem>>, vector<1x1x32xf32>
    %316 = vector.shape_cast %315 : vector<1x1x32xf32> to vector<1x32xf32>
    %c0_192 = arith.constant 0 : index
    %c0_193 = arith.constant 0 : index
    %c0_194 = arith.constant 0 : index
    %317 = vector.load %arg19[%c0_192, %c0_193, %c0_194] : memref<1x1x32xf32, #tpu.memory_space<vmem>>, vector<1x1x32xf32>
    %318 = vector.shape_cast %317 : vector<1x1x32xf32> to vector<1x32xf32>
    %cst_195 = arith.constant dense<0.000000e+00> : vector<16xf32>
    %319 = vector.multi_reduction <add>, %314, %cst_195 [1] : vector<16x32xf32> to vector<16xf32>
    %320 = vector.shape_cast %319 : vector<16xf32> to vector<16x1xf32>
    %cst_196 = arith.constant 3.200000e+01 : f32
    %321 = vector.broadcast %cst_196 : f32 to vector<16x1xf32>
    %322 = arith.divf %320, %321 : vector<16x1xf32>
    %323 = vector.broadcast %322 : vector<16x1xf32> to vector<16x32xf32>
    %324 = arith.subf %314, %323 : vector<16x32xf32>
    %325 = arith.mulf %324, %324 : vector<16x32xf32>
    %cst_197 = arith.constant dense<0.000000e+00> : vector<16xf32>
    %326 = vector.multi_reduction <add>, %325, %cst_197 [1] : vector<16x32xf32> to vector<16xf32>
    %327 = vector.shape_cast %326 : vector<16xf32> to vector<16x1xf32>
    %cst_198 = arith.constant 3.200000e+01 : f32
    %328 = vector.broadcast %cst_198 : f32 to vector<16x1xf32>
    %329 = arith.divf %327, %328 : vector<16x1xf32>
    %330 = vector.broadcast %322 : vector<16x1xf32> to vector<16x32xf32>
    %331 = arith.subf %314, %330 : vector<16x32xf32>
    %cst_199 = arith.constant 9.99999996E-13 : f32
    %332 = vector.broadcast %cst_199 : f32 to vector<16x1xf32>
    %333 = arith.addf %329, %332 : vector<16x1xf32>
    %334 = math.rsqrt %333 : vector<16x1xf32>
    %335 = vector.broadcast %334 : vector<16x1xf32> to vector<16x32xf32>
    %336 = arith.mulf %331, %335 : vector<16x32xf32>
    %337 = vector.broadcast %316 : vector<1x32xf32> to vector<16x32xf32>
    %338 = arith.mulf %336, %337 : vector<16x32xf32>
    %339 = vector.broadcast %318 : vector<1x32xf32> to vector<16x32xf32>
    %340 = arith.addf %338, %339 : vector<16x32xf32>
    %c0_200 = arith.constant 0 : index
    %c0_201 = arith.constant 0 : index
    %341 = vector.load %arg21[%c0_200, %c0_201] : memref<16x32xf32, #tpu.memory_space<vmem>>, vector<16x32xf32>
    tpu.vector_store %arg21[%c0_200, %c0_201], %340 {strides = array<i32>} : memref<16x32xf32, #tpu.memory_space<vmem>>, vector<16x32xf32>,
    %c0_202 = arith.constant 0 : index
    %c0_203 = arith.constant 0 : index
    %342 = vector.load %arg20[%c0_202, %c0_203] : memref<16x32xf32, #tpu.memory_space<vmem>>, vector<16x32xf32>
    tpu.vector_store %arg20[%c0_202, %c0_203], %340 {strides = array<i32>} : memref<16x32xf32, #tpu.memory_space<vmem>>, vector<16x32xf32>,
    return
  }
  func.func @transform_0(%arg0: i32) -> (i32, i32) {
    %c0_i32 = arith.constant 0 : i32
    %c0_i32_0 = arith.constant 0 : i32
    %c0_i32_1 = arith.constant 0 : i32
    return %c0_i32, %c0_i32_0 : i32, i32
  }
  func.func @transform_1(%arg0: i32) -> (i32, i32) {
    %c0_i32 = arith.constant 0 : i32
    %c0_i32_0 = arith.constant 0 : i32
    %c0_i32_1 = arith.constant 0 : i32
    return %c0_i32, %c0_i32_0 : i32, i32
  }
  func.func @transform_2(%arg0: i32) -> (i32, i32) {
    %c0_i32 = arith.constant 0 : i32
    %c0_i32_0 = arith.constant 0 : i32
    %c0_i32_1 = arith.constant 0 : i32
    return %c0_i32, %c0_i32_0 : i32, i32
  }
  func.func @transform_3(%arg0: i32) -> (i32, i32, i32, i32) {
    %c0_i32 = arith.constant 0 : i32
    %c0_i32_0 = arith.constant 0 : i32
    %c0_i32_1 = arith.constant 0 : i32
    %c0_i32_2 = arith.constant 0 : i32
    return %arg0, %c0_i32, %c0_i32_0, %c0_i32_1 : i32, i32, i32, i32
  }
  func.func @transform_4(%arg0: i32) -> (i32, i32, i32, i32) {
    %c0_i32 = arith.constant 0 : i32
    %c0_i32_0 = arith.constant 0 : i32
    %c0_i32_1 = arith.constant 0 : i32
    %c0_i32_2 = arith.constant 0 : i32
    return %arg0, %c0_i32, %c0_i32_0, %c0_i32_1 : i32, i32, i32, i32
  }
  func.func @transform_5(%arg0: i32) -> (i32, i32, i32, i32) {
    %c0_i32 = arith.constant 0 : i32
    %c0_i32_0 = arith.constant 0 : i32
    %c0_i32_1 = arith.constant 0 : i32
    %c0_i32_2 = arith.constant 0 : i32
    return %arg0, %c0_i32, %c0_i32_0, %c0_i32_1 : i32, i32, i32, i32
  }
  func.func @transform_6(%arg0: i32) -> (i32, i32, i32, i32) {
    %c0_i32 = arith.constant 0 : i32
    %c0_i32_0 = arith.constant 0 : i32
    %c0_i32_1 = arith.constant 0 : i32
    %c0_i32_2 = arith.constant 0 : i32
    return %arg0, %c0_i32, %c0_i32_0, %c0_i32_1 : i32, i32, i32, i32
  }
  func.func @transform_7(%arg0: i32) -> (i32, i32, i32, i32) {
    %c0_i32 = arith.constant 0 : i32
    %c0_i32_0 = arith.constant 0 : i32
    %c0_i32_1 = arith.constant 0 : i32
    %c0_i32_2 = arith.constant 0 : i32
    return %arg0, %c0_i32, %c0_i32_0, %c0_i32_1 : i32, i32, i32, i32
  }
  func.func @transform_8(%arg0: i32) -> (i32, i32, i32, i32) {
    %c0_i32 = arith.constant 0 : i32
    %c0_i32_0 = arith.constant 0 : i32
    %c0_i32_1 = arith.constant 0 : i32
    %c0_i32_2 = arith.constant 0 : i32
    return %arg0, %c0_i32, %c0_i32_0, %c0_i32_1 : i32, i32, i32, i32
  }
  func.func @transform_9(%arg0: i32) -> (i32, i32, i32) {
    %c0_i32 = arith.constant 0 : i32
    %c0_i32_0 = arith.constant 0 : i32
    %c0_i32_1 = arith.constant 0 : i32
    return %arg0, %c0_i32, %c0_i32_0 : i32, i32, i32
  }
  func.func @transform_10(%arg0: i32) -> (i32, i32, i32) {
    %c0_i32 = arith.constant 0 : i32
    %c0_i32_0 = arith.constant 0 : i32
    %c0_i32_1 = arith.constant 0 : i32
    return %arg0, %c0_i32, %c0_i32_0 : i32, i32, i32
  }
  func.func @transform_11(%arg0: i32) -> (i32, i32, i32) {
    %c0_i32 = arith.constant 0 : i32
    %c0_i32_0 = arith.constant 0 : i32
    %c0_i32_1 = arith.constant 0 : i32
    return %arg0, %c0_i32, %c0_i32_0 : i32, i32, i32
  }
  func.func @transform_12(%arg0: i32) -> (i32, i32, i32) {
    %c0_i32 = arith.constant 0 : i32
    %c0_i32_0 = arith.constant 0 : i32
    %c0_i32_1 = arith.constant 0 : i32
    return %arg0, %c0_i32, %c0_i32_0 : i32, i32, i32
  }
  func.func @transform_13(%arg0: i32) -> (i32, i32, i32) {
    %c0_i32 = arith.constant 0 : i32
    %c0_i32_0 = arith.constant 0 : i32
    %c0_i32_1 = arith.constant 0 : i32
    return %arg0, %c0_i32, %c0_i32_0 : i32, i32, i32
  }
  func.func @transform_14(%arg0: i32) -> (i32, i32, i32) {
    %c0_i32 = arith.constant 0 : i32
    %c0_i32_0 = arith.constant 0 : i32
    %c0_i32_1 = arith.constant 0 : i32
    return %arg0, %c0_i32, %c0_i32_0 : i32, i32, i32
  }
  func.func @transform_15(%arg0: i32) -> (i32, i32, i32) {
    %c0_i32 = arith.constant 0 : i32
    %c0_i32_0 = arith.constant 0 : i32
    %c0_i32_1 = arith.constant 0 : i32
    return %arg0, %c0_i32, %c0_i32_0 : i32, i32, i32
  }
  func.func @transform_16(%arg0: i32) -> (i32, i32, i32) {
    %c0_i32 = arith.constant 0 : i32
    %c0_i32_0 = arith.constant 0 : i32
    %c0_i32_1 = arith.constant 0 : i32
    return %arg0, %c0_i32, %c0_i32_0 : i32, i32, i32
  }
  func.func @transform_17(%arg0: i32) -> (i32, i32, i32) {
    %c0_i32 = arith.constant 0 : i32
    %c0_i32_0 = arith.constant 0 : i32
    %c0_i32_1 = arith.constant 0 : i32
    return %arg0, %c0_i32, %c0_i32_0 : i32, i32, i32
  }
  func.func @transform_18(%arg0: i32) -> (i32, i32, i32) {
    %c0_i32 = arith.constant 0 : i32
    %c0_i32_0 = arith.constant 0 : i32
    %c0_i32_1 = arith.constant 0 : i32
    return %arg0, %c0_i32, %c0_i32_0 : i32, i32, i32
  }
  func.func @transform_19(%arg0: i32) -> (i32, i32) {
    %c0_i32 = arith.constant 0 : i32
    %c0_i32_0 = arith.constant 0 : i32
    %c0_i32_1 = arith.constant 0 : i32
    return %c0_i32, %c0_i32_0 : i32, i32
  }
}

</mosaic_0001>

<bundles_post_ra>
// kernel: bert_forward.1
= control target key start
LH: loop header
LB: loop body
LE: loop exit
PB: predicated region body
PF: predicated region fallthrough
CT: control target
= control target key end

     0   :  { %s4260_s0 = inlined_call_operand.vmem [shape: f32[16,32], index: 0, kind: input, shape index: {}]   ;;  %s4261_s1 = inlined_call_operand.vmem [shape: f32[1,32], index: 1, kind: input, shape index: {}]   ;;  %s4262_s2 = inlined_call_operand.vmem [shape: f32[1,32], index: 2, kind: input, shape index: {}]   ;;  %s4263_s3 = inlined_call_operand.vmem [shape: bf16[2,4,32,8], index: 3, kind: input, shape index: {}]   ;;  %s4264_s4 = inlined_call_operand.vmem [shape: bf16[2,4,32,8], index: 4, kind: input, shape index: {}]   ;;  %s4265_s5 = inlined_call_operand.vmem [shape: bf16[2,4,32,8], index: 5, kind: input, shape index: {}]   ;;  %s4266_s6 = inlined_call_operand.vmem [shape: f32[2,4,1,8], index: 6, kind: input, shape index: {}]   ;;  %s4267_s7 = inlined_call_operand.vmem [shape: f32[2,4,1,8], index: 7, kind: input, shape index: {}]   ;;  %s4268_s8 = inlined_call_operand.vmem [shape: f32[2,4,1,8], index: 8, kind: input, shape index: {}]   ;;  %s4269_s9 = inlined_call_operand.vmem [shape: bf16[2,32,32], index: 9, kind: input, shape index: {}]   ;;  %s4270_s10 = inlined_call_operand.vmem [shape: f32[2,1,32], index: 10, kind: input, shape index: {}]   ;;  %s4271_s11 = inlined_call_operand.vmem [shape: f32[2,1,32], index: 11, kind: input, shape index: {}]   ;;  %s4272_s12 = inlined_call_operand.vmem [shape: f32[2,1,32], index: 12, kind: input, shape index: {}]   ;;  %s4273_s13 = inlined_call_operand.vmem [shape: bf16[2,32,64], index: 13, kind: input, shape index: {}]   ;;  %s4274_s14 = inlined_call_operand.vmem [shape: f32[2,1,64], index: 14, kind: input, shape index: {}]   ;;  %s4275_s15 = inlined_call_operand.vmem [shape: bf16[2,64,32], index: 15, kind: input, shape index: {}]   ;;  %s4276_s16 = inlined_call_operand.vmem [shape: f32[2,1,32], index: 16, kind: input, shape index: {}]   ;;  %s4277_s17 = inlined_call_operand.vmem [shape: f32[2,1,32], index: 17, kind: input, shape index: {}]   ;;  %s4278_s18 = inlined_call_operand.vmem [shape: f32[2,1,32], index: 18, kind: input, shape index: {}]   ;;  %s4279_s19 = inlined_call_operand.hbm [shape: f32[16,32], index: 19, kind: output, shape index: {}]  }
   0x1   :  { %4287 = sst [smem:[#allocation11_spill]] %s4260_s0 }
   0x2   :  { %4288 = sst [smem:[#allocation12_spill]] %s4261_s1 }
   0x3   :  { %4289 = sst [smem:[#allocation13_spill]] %s4262_s2 }
   0x4   :  { %4290 = sst [smem:[#allocation14_spill]] %s4263_s3 }
   0x5   :  { %4291 = sst [smem:[#allocation15_spill]] %s4264_s4 }
   0x6   :  { %4292 = sst [smem:[#allocation16_spill]] %s4265_s5 }
   0x7   :  { %4293 = sst [smem:[#allocation17_spill]] %s4266_s6 }
   0x8   :  { %4294 = sst [smem:[#allocation18_spill]] %s4267_s7 }
   0x9   :  { %4295 = sst [smem:[#allocation19_spill]] %s4268_s8 }
   0xa   :  { %4296 = sst [smem:[#allocation20_spill]] %s4269_s9 }
   0xb   :  { %4297 = sst [smem:[#allocation21_spill]] %s4270_s10 }
   0xc   :  { %4298 = sst [smem:[#allocation22_spill]] %s4279_s19 }
   0xd   :  { %24 = vsyncpa [#allocation5], 0  ;;  %s3830_s0 = smov 0  }
   0xe LB: > { %4299 = sst [smem:[#allocation7_spill]] %s3721_s0  ;;  %s3836_s30 = sadd.s32 4294967295, %s3721_s0   ;;  %s3721_s0 = sphi %s3830_s0, %s30_s0  }
   0xf   : > { %4300 = sst [smem:[#allocation8_spill]] %s3836_s30  ;;  %p3127_p0 = scmp.ge.s32.totalorder %s3721_s0, 1 }
  0x10   : > { %p666_p1 = scmp.lt.s32.totalorder %s3721_s0, 3 }
  0x12   : > { %p667_p2 = pnand %p3127_p0, %p666_p1 }
  0x14   : > { %670 = sbr.rel (%p667_p2) target bundleno = 5124 (0x1404), region = 96 }
  0x1b   : > { %p775_p3 = scmp.lt.s32.totalorder %s3836_s30, 1  ;;  %s4301_s23 = sld [smem:[#allocation14_spill]] }
  0x1c   : > { %s4302_s4 = sld [smem:[#allocation15_spill]]  ;;  %s4304_s5 = sld [smem:[#allocation16_spill]] }
  0x1d   : > { %s3842_s20 = scalar_select %p775_p3, %s3836_s30, 1 }
  0x1e   : > { %s4306_s6 = sld [smem:[#allocation17_spill]]  ;;  %s4307_s7 = sld [smem:[#allocation18_spill]] }
  0x1f   : > { %s3277_s21 = sshll.u32 %s3842_s20, 6  ;;  %s3134_s1 = sshll.u32 %s3842_s20, 2 }
  0x20   : > { %s4308_s8 = sld [smem:[#allocation19_spill]]  ;;  %s4310_s9 = sld [smem:[#allocation20_spill]] }
  0x21   : > { %s3849_s24 = scalar_lea.vmem %s4301_s23, %s3277_s21  ;;  %s837_s22 = scalar_lea.vmem %s4278_s18, %s3842_s20 }
  0x22   : > { %s3854_s26 = scalar_lea.vmem %s4302_s4, %s3277_s21  ;;  %s3859_s29 = scalar_lea.vmem %s4304_s5, %s3277_s21 }
  0x23   : > { %4303 = sst [smem:[#allocation9_spill]] %s3854_s26  ;;  %s3280_s26 = sshll.u32 %s3842_s20, 4 }
  0x24   : > { %4305 = sst [smem:[#allocation10_spill]] %s3859_s29  ;;  %s3864_s30 = scalar_lea.vmem %s4306_s6, %s3134_s1 }
  0x25   : > { %s3869_s23 = scalar_lea.vmem %s4307_s7, %s3134_s1  ;;  %s3282_s5 = sshll.u32 %s3842_s20, 5 }
  0x26   : > { %s3874_s4 = scalar_lea.vmem %s4308_s8, %s3134_s1  ;;  %s3884_s19 = scalar_lea.vmem %s4310_s9, %s3280_s26 }
  0x27   : > { %s3897_s8 = scalar_lea.vmem %s4273_s13, %s3280_s26  ;;  %s3907_s10 = scalar_lea.vmem %s4275_s15, %s3282_s5 }
  0x28   : > { %s831_s7 = scalar_lea.vmem %s4276_s16, %s3842_s20  ;;  %s834_s1 = scalar_lea.vmem %s4277_s17, %s3842_s20 }
  0x29   : > { %s4311_s27 = sld [smem:[#allocation8_spill]] }
  0x2f   : > { %p3143_p4 = scmp.ne.s32.totalorder %s4311_s27, 0 }
  0x30   : > { %s4312_s9 = sld [smem:[#allocation11_spill]] (!%p3143_p4)  ;;  %vm847_vm0 = vcmask (!%p3143_p4), 261120   ;;  %s4313_s6 = sld [smem:[#allocation12_spill]] (!%p3143_p4) }
  0x31   : > { %842 = sbr.rel (%p3143_p4) target bundleno = 373 (0x175), region = 100  ;;  %s4314_s26 = sld [smem:[#allocation13_spill]] (!%p3143_p4) }
  0x36   : > { %v843_v0 = vld [vmem:[%s4312_s9] sm:$0xff] (!%p3143_p4)  ;;  %v844_v1 = vld [vmem:[%s4312_s9 + $0x8] sm:$0xff] (!%p3143_p4) }
  0x37   : > { %v848_v2 = vsel (!%p3143_p4), %vm847_vm0, %v843_v0, 0.0  ;;  %v851_v3 = vsel (!%p3143_p4), %vm847_vm0, %v844_v1, 0.0  ;;  %v3144_v21 = vld [vmem:[%s4313_s6] ss:$0 sm:$0xff] (!%p3143_p4) }
  0x38   : > { %849 = vadd.xlane.f32.xlu0 %v848_v2  ;;  %v3145_v23 = vld [vmem:[%s4314_s26] ss:$0 sm:$0xff] }
  0x3c   : > { %852 = vadd.xlane.f32.xlu0 %v851_v3 }
  0xc5   : > { %v850_v4 = vpop.xlane.xlu0 %849 }
  0xc6   : > { %v855_v5 = vmul.f32 0.03125, %v850_v4 }
  0xc8   : > { %v857_v6 = vsub.f32 %v843_v0, %v855_v5 }
  0xc9   : > { %v853_v7 = vpop.xlane.xlu0 %852 }
  0xca   : > { %v856_v8 = vmul.f32 0.03125, %v853_v7  ;;  %v859_v9 = vmul.f32 %v857_v6, %v857_v6 }
  0xcc   : > { %v858_v10 = vsub.f32 %v844_v1, %v856_v8  ;;  %v861_v11 = vsel %vm847_vm0, %v859_v9, 0.0 }
  0xcd   : > { %862 = vadd.xlane.f32.xlu1 %v861_v11 }
  0xce   : > { %v860_v12 = vmul.f32 %v858_v10, %v858_v10 }
  0xd0   : > { %v864_v13 = vsel %vm847_vm0, %v860_v12, 0.0 }
  0xd1   : > { %865 = vadd.xlane.f32.xlu1 %v864_v13 }
 0x15a   : > { %v863_v14 = vpop.xlane.xlu1 %862 }
 0x15b   : > { %v867_v15 = vmul.f32 0.03125, %v863_v14 }
 0x15d   : > { %v869_v16 = vadd.f32 1e-12, %v867_v15 }
 0x15e   : > { %v866_v17 = vpop.xlane.xlu1 %865 }
 0x15f   : > { %3603 = vrsqrt.f32 %v869_v16  ;;  %v868_v18 = vmul.f32 0.03125, %v866_v17 }
 0x161   : > { %v870_v19 = vadd.f32 1e-12, %v868_v18 }
 0x163   : > { %3605 = vrsqrt.f32 %v870_v19 }
 0x169   : > { %v3604_v20 = vpop.eup %3603 }
 0x16a   : > { %v873_v22 = vmul.f32 %v3604_v20, %v857_v6 }
 0x16c   : > { %v881_v24 = vmul.f32 %v3144_v21, %v873_v22 }
 0x16d   : > { %v3606_v25 = vpop.eup %3605 }
 0x16e   : > { %v889_v26 = vadd.f32 %v3145_v23, %v881_v24  ;;  %v874_v27 = vmul.f32 %v3606_v25, %v858_v10 }
 0x170   : > { %891 = vst.msk [vmem:[#allocation2] sm:$0xff] %vm847_vm0, %v889_v26  ;;  %v882_v28 = vmul.f32 %v3144_v21, %v874_v27 }
 0x172   : > { %v890_v29 = vadd.f32 %v3145_v23, %v882_v28 }
 0x174   : > { %892 = vst.msk [vmem:[#allocation2 + $0x8] sm:$0xff] %vm847_vm0, %v890_v29 }
 0x175 PF: > { %s4315_s3 = sld [smem:[#allocation9_spill]]  ;;  %v3607_v30 = vld [vmem:[%s3849_s24] sm:$0xff]   ;;  %v3723_v31 = vmov 0.0   ;;  %v3608_v32 = vld [vmem:[%s3849_s24 + $0x8] sm:$0xff]   ;;  %vm3724_vm1 = vmmov 0   ;;  %vm919_vm2 = vcmask 261120   ;;  %s4320_s0 = scalar_lea.vmem %s4272_s12, %s3842_s20 }
 0x176   : > { %3362 = vmatprep.subr.bf16.mxu1 %v3723_v31  ;;  %3378 = vmatprep.subr.bf16.mxu0 %v3723_v31  ;;  %v3150_v42 = vld [vmem:[%s3869_s23] ss:$0 sm:$0xff]  ;;  %vm1095_vm3 = vcmask 64512   ;;  %s4316_s27 = sld [smem:[#allocation10_spill]]  ;;  %vm1157_vm4 = vcmask 1043456   ;;  %v3615_v24 = vld [vmem:[%s3849_s24 + $0x10] sm:$0xff]  }
 0x177   : > { %3363 = vmatpush3.bf16.msra.mxu1 %v3607_v30  ;;  %3366 = vmatprep.mubr.msk.bf16.mxu1 %vm3724_vm1, %v3723_v31  ;;  %v893_v33 = vld [vmem:[#allocation2] sm:$0xff]  ;;  %v3616_v25 = vld [vmem:[%s3849_s24 + $0x18] sm:$0xff]   ;;  %vm1619_vm5 = vcmask 130112   ;;  %vm2042_vm6 = vcmask 195712   ;;  %vm2465_vm7 = vcmask 261312   ;;  %s4317_s28 = sld [smem:[#allocation21_spill]] }
 0x178   : > { %3364 = vmatprep.subr.bf16.mxu1 %v3723_v31  ;;  %3382 = vmatprep.mubr.msk.bf16.mxu0 %vm3724_vm1, %v3723_v31  ;;  %v3146_v49 = vld [vmem:[%s3864_s30] ss:$0 sm:$0xff]  ;;  %vm2822_vm8 = vcmask 523264  }
 0x179   : > { %v3154_v6 = vld [vmem:[%s3874_s4] ss:$0 sm:$0xff] }
 0x17b   : > { %v894_v34 = vld [vmem:[#allocation2 + $0x8] sm:$0xff]  ;;  %v3609_v35 = vld [vmem:[%s4315_s3] sm:$0xff]   ;;  %3365 = vmatpush3.bf16.msra.mxu1 %v3608_v32 }
 0x17c   : > { %v3950_v36 = vpack.c.bf16 %v894_v34, %v893_v33  ;;  %3370 = vmatprep.subr.bf16.mxu1 %v3723_v31  ;;  %v3610_v37 = vld [vmem:[%s4315_s3 + $0x8] sm:$0xff]   ;;  %v3611_v58 = vld [vmem:[%s4316_s27] sm:$0xff]  }
 0x17d   : > { %3379 = vmatpush3.bf16.msra.mxu0 %v3611_v58  ;;  %v3612_v59 = vld [vmem:[%s4316_s27 + $0x8] sm:$0xff]   ;;  %v3167_v58 = vld [vmem:[%s3864_s30 + $0x1] ss:$0 sm:$0xff]  ;;  %s4318_s5 = scalar_lea.vmem %s4317_s28, %s3842_s20  ;;  %s3728_s28 = smov [#allocation4]  }
 0x17e   : > { %3367 = vmatmul.mubr.msk.bf16.vlgmr.msra.gmra.mrb[0].mxu1 %vm919_vm2, %v3950_v36  ;;  %3380 = vmatprep.subr.bf16.mxu0 %v3723_v31 }
 0x17f   : > { %3371 = vmatpush3.bf16.msra.mxu1 %v3609_v35  ;;  %3374 = vmatprep.mubr.msk.bf16.mxu1 %vm3724_vm1, %v3723_v31 }
 0x180   : > { %3372 = vmatprep.subr.bf16.mxu1 %v3723_v31 }
 0x181   : > { %3381 = vmatpush3.bf16.msra.mxu0 %v3612_v59 }
 0x182   : > { %3392 = vmatprep.subr.bf16.mxu0 %v3723_v31 }
 0x183   : > { %3373 = vmatpush3.bf16.msra.mxu1 %v3610_v37 }
 0x184   : > { %3386 = vmatprep.subr.bf16.mxu1 %v3723_v31  ;;  %3383 = vmatmul.mubr.msk.bf16.vlgmr.msra.gmra.mrb[0].mxu0 %vm919_vm2, %v3950_v36 }
 0x185   : > { %3394 = vmatprep.mubr.msk.bf16.mxu0 %vm3724_vm1, %v3723_v31 }
 0x186   : > { %3375 = vmatmul.mubr.msk.bf16.vlgmr.msra.gmra.mrb[4].mxu1 %vm919_vm2, %v3950_v36 }
 0x187   : > { %3388 = vmatprep.mubr.msk.bf16.mxu1 %vm3724_vm1, %v3723_v31 }
 0x251   : > { %v957_v38 = vpop.f32.mrb[0].mxu1 }
 0x252   : > { %v3368_v39 = vpop.f32.mrb[1].mxu1  ;;  %v958_v52 = vadd.f32 %v3146_v49, %v957_v38  ;;  %v3613_v38 = vld [vmem:[%s4315_s3 + $0x10] sm:$0xff]  }
 0x253   : > { %v960_v40 = vpop.f32.mrb[2].mxu1 }
 0x254   : > { %v3369_v41 = vpop.f32.mrb[3].mxu1  ;;  %v1092_v54 = vpack.c.bf16 %v958_v52, %v958_v52  ;;  %v961_v56 = vadd.f32 %v3146_v49, %v960_v40  ;;  %v3614_v40 = vld [vmem:[%s4315_s3 + $0x18] sm:$0xff]  }
 0x256   : > { %v1202_v57 = vpack.c.bf16 %v961_v56, %v961_v56 }
 0x257   : > { %v1085_v7 = vpop.f32.mrb[0].mxu0 }
 0x258   : > { %v1086_v8 = vadd.f32 %v3154_v6, %v1085_v7  ;;  %v3384_v9 = vpop.f32.mrb[1].mxu0 }
 0x259   : > { %v1021_v43 = vpop.f32.mrb[4].mxu1  ;;  %v1088_v22 = vpop.f32.mrb[2].mxu0 }
 0x25a   : > { %v1022_v44 = vadd.f32 %v3150_v42, %v1021_v43  ;;  %v3376_v45 = vpop.f32.mrb[5].mxu1  ;;  %v1094_v10 = vpack.c.bf16 %v1086_v8, %v1086_v8  ;;  %v3385_v23 = vpop.f32.mrb[3].mxu0  ;;  %v1089_v27 = vadd.f32 %v3154_v6, %v1088_v22  ;;  %v3618_v6 = vld [vmem:[%s4316_s27 + $0x18] sm:$0xff]  }
 0x25b   : > { %v1024_v46 = vpop.f32.mrb[6].mxu1 }
 0x25c   : > { %v1093_v47 = vpack.c.bf16 %v1022_v44, %v1022_v44  ;;  %v3377_v48 = vpop.f32.mrb[7].mxu1  ;;  %v1025_v51 = vadd.f32 %v3150_v42, %v1024_v46  ;;  %v1159_v11 = vsel %vm1157_vm4, %v1094_v10, 0  ;;  %v1204_v32 = vpack.c.bf16 %v1089_v27, %v1089_v27 }
 0x25d   : > { %3393 = vmatpush3.bf16.msra.mxu0 %v1159_v11 }
 0x25e   : > { %v1100_v50 = vsel %vm1095_vm3, %v1093_v47, 0  ;;  %v1203_v53 = vpack.c.bf16 %v1025_v51, %v1025_v51  ;;  %3404 = vmatprep.subr.bf16.mxu0 %v3723_v31  ;;  %v1267_v34 = vsel %vm1157_vm4, %v1204_v32, 0 }
 0x25f   : > { %3387 = vmatpush3.bf16.xpose.msra.mxu1 %v1100_v50 }
 0x260   : > { %3398 = vmatprep.subr.bf16.mxu1 %v3723_v31  ;;  %v1209_v55 = vsel %vm1095_vm3, %v1203_v53, 0  ;;  %v3176_v53 = vld [vmem:[%s3869_s23 + $0x1] ss:$0 sm:$0xff] }
 0x266   : > { %3389 = vmatmul.mubr.msk.bf16.vlgmr.msra.gmra.mrb[8].mxu1 %vm1095_vm3, %v1092_v54 }
 0x267   : > { %3399 = vmatpush3.bf16.xpose.msra.mxu1 %v1209_v55  ;;  %3400 = vmatprep.mubr.msk.bf16.mxu1 %vm3724_vm1, %v3723_v31 }
 0x268   : > { %3410 = vmatprep.subr.bf16.mxu1 %v3723_v31 }
 0x26e   : > { %3401 = vmatmul.mubr.msk.bf16.vlgmr.msra.gmra.mrb[12].mxu1 %vm1095_vm3, %v1202_v57 }
 0x26f   : > { %3414 = vmatprep.mubr.msk.bf16.mxu1 %vm3724_vm1, %v3723_v31  ;;  %3411 = vmatpush3.bf16.msra.mxu1 %v3615_v24 }
 0x270   : > { %3412 = vmatprep.subr.bf16.mxu1 %v3723_v31 }
 0x273   : > { %3413 = vmatpush3.bf16.msra.mxu1 %v3616_v25 }
 0x274   : > { %3426 = vmatprep.subr.bf16.mxu1 %v3723_v31 }
 0x276   : > { %3415 = vmatmul.mubr.msk.bf16.vlgmr.msra.gmra.mrb[16].mxu1 %vm919_vm2, %v3950_v36 }
 0x277   : > { %3430 = vmatprep.mubr.msk.bf16.mxu1 %vm3724_vm1, %v3723_v31 }
 0x339   : > { %v1136_v60 = vpop.f32.mrb[8].mxu1 }
 0x33a   : > { %v3390_v61 = vpop.f32.mrb[9].mxu1  ;;  %v1142_v62 = vsel %vm1095_vm3, %v1136_v60, -inf }
 0x33b   : > { %1143 = vmax.xlane.f32.xlu0 %v1142_v62  ;;  %v1139_v63 = vpop.f32.mrb[10].mxu1 }
 0x33c   : > { %v3391_v0 = vpop.f32.mrb[11].mxu1 }
 0x341   : > { %v1245_v1 = vpop.f32.mrb[12].mxu1 }
 0x342   : > { %v3402_v2 = vpop.f32.mrb[13].mxu1  ;;  %v1251_v3 = vsel %vm1095_vm3, %v1245_v1, -inf }
 0x343   : > { %1252 = vmax.xlane.f32.xlu0 %v1251_v3  ;;  %v1248_v4 = vpop.f32.mrb[14].mxu1 }
 0x344   : > { %v3403_v5 = vpop.f32.mrb[15].mxu1 }
 0x345   : > { %v3617_v5 = vld [vmem:[%s4316_s27 + $0x10] sm:$0xff]  }
 0x346   : > { %3427 = vmatpush3.bf16.msra.mxu1 %v3617_v5  ;;  %v3198_v5 = vld [vmem:[%s3864_s30 + $0x2] ss:$0 sm:$0xff] }
 0x347   : > { %3428 = vmatprep.subr.bf16.mxu1 %v3723_v31 }
 0x349   : > { %v1369_v41 = vpop.f32.mrb[16].mxu1 }
 0x34a   : > { %v3416_v42 = vpop.f32.mrb[17].mxu1  ;;  %v1370_v63 = vadd.f32 %v3167_v58, %v1369_v41  ;;  %3429 = vmatpush3.bf16.msra.mxu1 %v3618_v6 }
 0x34b   : > { %v1372_v43 = vpop.f32.mrb[18].mxu1  ;;  %3440 = vmatprep.subr.bf16.mxu1 %v3723_v31 }
 0x34c   : > { %v3417_v44 = vpop.f32.mrb[19].mxu1  ;;  %v1373_v3 = vadd.f32 %v3167_v58, %v1372_v43 }
 0x34d   : > { %3431 = vmatmul.mubr.msk.bf16.vlgmr.msra.gmra.mrb[20].mxu1 %vm919_vm2, %v3950_v36 }
 0x34e   : > { %v1621_v4 = vpack.c.bf16 %v1373_v3, %v1373_v3  ;;  %3442 = vmatprep.mubr.msk.bf16.mxu1 %vm3724_vm1, %v3723_v31 }
 0x3c8   : > { %v1144_v12 = vpop.xlane.xlu0 %1143 }
 0x3c9   : > { %v1145_v13 = vsub.f32 %v1136_v60, %v1144_v12 }
 0x3cb   : > { %v1146_v14 = vmul.f32 1.442695, %v1145_v13 }
 0x3cd   : > { %3639 = vpow2.f32 %v1146_v14 }
 0x3d0   : > { %v1253_v15 = vpop.xlane.xlu0 %1252 }
 0x3d1   : > { %v1254_v16 = vsub.f32 %v1245_v1, %v1253_v15  ;;  %v1508_v1 = vpack.c.bf16 %v1370_v63, %v1370_v63 }
 0x3d3   : > { %v1255_v17 = vmul.f32 1.442695, %v1254_v16 }
 0x3d5   : > { %3641 = vpow2.f32 %v1255_v17 }
 0x3d7   : > { %v3640_v18 = vpop.eup %3639 }
 0x3d8   : > { %v1148_v19 = vsel %vm1095_vm3, %v3640_v18, 0.0 }
 0x3d9   : > { %1149 = vadd.xlane.f32.xlu1 %v1148_v19 }
 0x3df   : > { %v3642_v20 = vpop.eup %3641 }
 0x3e0   : > { %v1257_v21 = vsel %vm1095_vm3, %v3642_v20, 0.0 }
 0x3e1   : > { %1258 = vadd.xlane.f32.xlu1 %v1257_v21 }
 0x420   : > { %v1501_v27 = vpop.f32.mrb[20].mxu1 }
 0x466   : > { %v1150_v26 = vpop.xlane.xlu1 %1149 }
 0x467   : > { %3643 = vrcp.f32 %v1150_v26 }
 0x46e   : > { %v1259_v28 = vpop.xlane.xlu1 %1258 }
 0x46f   : > { %3645 = vrcp.f32 %v1259_v28  ;;  %v3432_v28 = vpop.f32.mrb[21].mxu1 }
 0x470   : > { %v3216_v28 = vld [vmem:[%s3874_s4 + $0x2] ss:$0 sm:$0xff] }
 0x471   : > { %v3644_v29 = vpop.eup %3643 }
 0x472   : > { %v1152_v30 = vmul.f32 %v3644_v29, %v3640_v18  ;;  %v3185_v29 = vld [vmem:[%s3874_s4 + $0x1] ss:$0 sm:$0xff] }
 0x473   : > { %v1502_v32 = vadd.f32 %v3185_v29, %v1501_v27 }
 0x474   : > { %v1153_v33 = vpack.c.bf16 %v1152_v30, %v1152_v30  ;;  %v1504_v30 = vpop.f32.mrb[22].mxu1 }
 0x476   : > { %3395 = vmatmul.mubr.msk.bf16.vlgmr.msra.gmra.mrb[4].mxu0 %vm1095_vm3, %v1153_v33  ;;  %v3433_v33 = vpop.f32.mrb[23].mxu1 }
 0x477   : > { %3405 = vmatpush3.bf16.msra.mxu0 %v1267_v34  ;;  %3406 = vmatprep.mubr.msk.bf16.mxu0 %vm3724_vm1, %v3723_v31  ;;  %v1505_v34 = vadd.f32 %v3185_v29, %v1504_v30 }
 0x478   : > { %3418 = vmatprep.subr.bf16.mxu0 %v3723_v31 }
 0x479   : > { %v3646_v35 = vpop.eup %3645  ;;  %v1623_v44 = vpack.c.bf16 %v1505_v34, %v1505_v34 }
 0x47a   : > { %v1261_v37 = vmul.f32 %v3646_v35, %v3642_v20  ;;  %v1510_v35 = vpack.c.bf16 %v1502_v32, %v1502_v32 }
 0x47c   : > { %v1262_v39 = vpack.c.bf16 %v1261_v37, %v1261_v37  ;;  %v1573_v37 = vsel %vm1157_vm4, %v1510_v35, 0 }
 0x47d   : > { %3441 = vmatpush3.bf16.msra.mxu1 %v1573_v37 }
 0x47e   : > { %3407 = vmatmul.mubr.msk.bf16.vlgmr.msra.gmra.mrb[8].mxu0 %vm1095_vm3, %v1262_v39  ;;  %3452 = vmatprep.subr.bf16.mxu1 %v3723_v31  ;;  %v3622_v39 = vld [vmem:[%s3849_s24 + $0x28] sm:$0xff]  }
 0x47f   : > { %3419 = vmatpush3.bf16.msra.mxu0 %v3613_v38  ;;  %3422 = vmatprep.mubr.msk.bf16.mxu0 %vm3724_vm1, %v3723_v31  ;;  %v3621_v38 = vld [vmem:[%s3849_s24 + $0x20] sm:$0xff]  }
 0x480   : > { %3420 = vmatprep.subr.bf16.mxu0 %v3723_v31 }
 0x483   : > { %3421 = vmatpush3.bf16.msra.mxu0 %v3614_v40 }
 0x484   : > { %3434 = vmatprep.subr.bf16.mxu0 %v3723_v31 }
 0x486   : > { %3423 = vmatmul.mubr.msk.bf16.vlgmr.msra.gmra.mrb[12].mxu0 %vm919_vm2, %v3950_v36 }
 0x487   : > { %3436 = vmatprep.mubr.msk.bf16.mxu0 %vm3724_vm1, %v3723_v31 }
 0x549   : > { %v1195_v45 = vpop.f32.mrb[4].mxu0 }
 0x54a   : > { %1201 = vst.msk [vmem:[#allocation3] sm:$0xff] %vm1095_vm3, %v1195_v45  ;;  %v3396_v46 = vpop.f32.mrb[5].mxu0 }
 0x54b   : > { %v1198_v47 = vpop.f32.mrb[6].mxu0  ;;  %v1686_v46 = vsel %vm1157_vm4, %v1623_v44, 0 }
 0x54c   : > { %v3397_v48 = vpop.f32.mrb[7].mxu0 }
 0x551   : > { %v1303_v49 = vpop.f32.mrb[8].mxu0 }
 0x552   : > { %1309 = vst.msk [vmem:[#allocation3 + $0x8] sm:$0xff] %vm1095_vm3, %v1303_v49  ;;  %v3408_v50 = vpop.f32.mrb[9].mxu0  ;;  %v3619_v49 = vld [vmem:[%s4315_s3 + $0x20] sm:$0xff]  }
 0x553   : > { %v1306_v51 = vpop.f32.mrb[10].mxu0 }
 0x554   : > { %v3409_v52 = vpop.f32.mrb[11].mxu0  ;;  %v3620_v51 = vld [vmem:[%s4315_s3 + $0x28] sm:$0xff]  }
 0x559   : > { %v1435_v54 = vpop.f32.mrb[12].mxu0 }
 0x55a   : > { %v1436_v55 = vadd.f32 %v3176_v53, %v1435_v54  ;;  %v3424_v56 = vpop.f32.mrb[13].mxu0 }
 0x55b   : > { %v1438_v57 = vpop.f32.mrb[14].mxu0 }
 0x55c   : > { %v1509_v59 = vpack.c.bf16 %v1436_v55, %v1436_v55  ;;  %v3425_v60 = vpop.f32.mrb[15].mxu0  ;;  %v1439_v62 = vadd.f32 %v3176_v53, %v1438_v57 }
 0x55e   : > { %v1515_v61 = vsel %vm1095_vm3, %v1509_v59, 0  ;;  %v1622_v0 = vpack.c.bf16 %v1439_v62, %v1439_v62 }
 0x55f   : > { %3435 = vmatpush3.bf16.xpose.msra.mxu0 %v1515_v61 }
 0x560   : > { %3446 = vmatprep.subr.bf16.mxu0 %v3723_v31  ;;  %v1628_v2 = vsel %vm1095_vm3, %v1622_v0, 0  ;;  %v3207_v0 = vld [vmem:[%s3869_s23 + $0x2] ss:$0 sm:$0xff] }
 0x566   : > { %3437 = vmatmul.mubr.msk.bf16.vlgmr.msra.gmra.mrb[16].mxu0 %vm1095_vm3, %v1508_v1 }
 0x567   : > { %3447 = vmatpush3.bf16.xpose.msra.mxu0 %v1628_v2  ;;  %3448 = vmatprep.mubr.msk.bf16.mxu0 %vm3724_vm1, %v3723_v31 }
 0x568   : > { %3458 = vmatprep.subr.bf16.mxu0 %v3723_v31 }
 0x56e   : > { %3449 = vmatmul.mubr.msk.bf16.vlgmr.msra.gmra.mrb[20].mxu0 %vm1095_vm3, %v1621_v4 }
 0x56f   : > { %3462 = vmatprep.mubr.msk.bf16.mxu0 %vm3724_vm1, %v3723_v31  ;;  %3459 = vmatpush3.bf16.msra.mxu0 %v3621_v38 }
 0x570   : > { %3460 = vmatprep.subr.bf16.mxu0 %v3723_v31 }
 0x573   : > { %3461 = vmatpush3.bf16.msra.mxu0 %v3622_v39 }
 0x574   : > { %3474 = vmatprep.subr.bf16.mxu0 %v3723_v31 }
 0x576   : > { %3463 = vmatmul.mubr.msk.bf16.vlgmr.msra.gmra.mrb[24].mxu0 %vm919_vm2, %v3950_v36 }
 0x577   : > { %3478 = vmatprep.mubr.msk.bf16.mxu0 %vm3724_vm1, %v3723_v31 }
 0x639   : > { %v1551_v7 = vpop.f32.mrb[16].mxu0 }
 0x63a   : > { %v3438_v8 = vpop.f32.mrb[17].mxu0  ;;  %v1557_v9 = vsel %vm1095_vm3, %v1551_v7, -inf }
 0x63b   : > { %1558 = vmax.xlane.f32.xlu0 %v1557_v9  ;;  %v1554_v10 = vpop.f32.mrb[18].mxu0 }
 0x63c   : > { %v3439_v11 = vpop.f32.mrb[19].mxu0 }
 0x641   : > { %v1664_v12 = vpop.f32.mrb[20].mxu0 }
 0x642   : > { %v3450_v13 = vpop.f32.mrb[21].mxu0  ;;  %v1670_v14 = vsel %vm1095_vm3, %v1664_v12, -inf }
 0x643   : > { %1671 = vmax.xlane.f32.xlu1 %v1670_v14  ;;  %v1667_v15 = vpop.f32.mrb[22].mxu0 }
 0x644   : > { %v3451_v16 = vpop.f32.mrb[23].mxu0 }
 0x645   : > { %v3623_v16 = vld [vmem:[%s4316_s27 + $0x20] sm:$0xff]  }
 0x646   : > { %3475 = vmatpush3.bf16.msra.mxu0 %v3623_v16 }
 0x647   : > { %3476 = vmatprep.subr.bf16.mxu0 %v3723_v31 }
 0x649   : > { %v1792_v52 = vpop.f32.mrb[24].mxu0 }
 0x64a   : > { %v3464_v53 = vpop.f32.mrb[25].mxu0  ;;  %v1793_v10 = vadd.f32 %v3198_v5, %v1792_v52 }
 0x64b   : > { %v1795_v54 = vpop.f32.mrb[26].mxu0 }
 0x64c   : > { %v3465_v55 = vpop.f32.mrb[27].mxu0  ;;  %v1796_v14 = vadd.f32 %v3198_v5, %v1795_v54 }
 0x64e   : > { %v2044_v15 = vpack.c.bf16 %v1796_v14, %v1796_v14 }
 0x6c8   : > { %v1559_v17 = vpop.xlane.xlu0 %1558 }
 0x6c9   : > { %v1560_v18 = vsub.f32 %v1551_v7, %v1559_v17  ;;  %v3624_v17 = vld [vmem:[%s4316_s27 + $0x28] sm:$0xff]  }
 0x6ca   : > { %3477 = vmatpush3.bf16.msra.mxu0 %v3624_v17 }
 0x6cb   : > { %v1561_v19 = vmul.f32 1.442695, %v1560_v18  ;;  %3488 = vmatprep.subr.bf16.mxu0 %v3723_v31 }
 0x6cd   : > { %3647 = vpow2.f32 %v1561_v19  ;;  %3479 = vmatmul.mubr.msk.bf16.vlgmr.msra.gmra.mrb[28].mxu0 %vm919_vm2, %v3950_v36 }
 0x6ce   : > { %3490 = vmatprep.mubr.msk.bf16.mxu0 %vm3724_vm1, %v3723_v31 }
 0x6d0   : > { %v1672_v20 = vpop.xlane.xlu1 %1671 }
 0x6d1   : > { %v1673_v21 = vsub.f32 %v1664_v12, %v1672_v20  ;;  %v1931_v12 = vpack.c.bf16 %v1793_v10, %v1793_v10 }
 0x6d3   : > { %v1674_v22 = vmul.f32 1.442695, %v1673_v21 }
 0x6d5   : > { %3649 = vpow2.f32 %v1674_v22 }
 0x6d7   : > { %v3648_v23 = vpop.eup %3647 }
 0x6d8   : > { %v1563_v24 = vsel %vm1095_vm3, %v3648_v23, 0.0 }
 0x6d9   : > { %1564 = vadd.xlane.f32.xlu0 %v1563_v24 }
 0x6df   : > { %v3650_v25 = vpop.eup %3649 }
 0x6e0   : > { %v1676_v26 = vsel %vm1095_vm3, %v3650_v25, 0.0 }
 0x6e1   : > { %1677 = vadd.xlane.f32.xlu1 %v1676_v26 }
 0x766   : > { %v1565_v40 = vpop.xlane.xlu0 %1564 }
 0x767   : > { %3651 = vrcp.f32 %v1565_v40 }
 0x76e   : > { %v1678_v41 = vpop.xlane.xlu1 %1677 }
 0x76f   : > { %3653 = vrcp.f32 %v1678_v41 }
 0x771   : > { %v3652_v42 = vpop.eup %3651 }
 0x772   : > { %v1567_v43 = vmul.f32 %v3652_v42, %v3648_v23 }
 0x774   : > { %v1568_v45 = vpack.c.bf16 %v1567_v43, %v1567_v43 }
 0x776   : > { %3443 = vmatmul.mubr.msk.bf16.vlgmr.msra.gmra.mrb[24].mxu1 %vm1095_vm3, %v1568_v45 }
 0x777   : > { %3453 = vmatpush3.bf16.msra.mxu1 %v1686_v46  ;;  %3454 = vmatprep.mubr.msk.bf16.mxu1 %vm3724_vm1, %v3723_v31 }
 0x778   : > { %3466 = vmatprep.subr.bf16.mxu1 %v3723_v31 }
 0x779   : > { %v3654_v47 = vpop.eup %3653 }
 0x77a   : > { %v1680_v48 = vmul.f32 %v3654_v47, %v3650_v25 }
 0x77c   : > { %v1681_v50 = vpack.c.bf16 %v1680_v48, %v1680_v48  ;;  %v3627_v48 = vld [vmem:[%s3849_s24 + $0x30] sm:$0xff]  }
 0x77e   : > { %3455 = vmatmul.mubr.msk.bf16.vlgmr.msra.gmra.mrb[28].mxu1 %vm1095_vm3, %v1681_v50 }
 0x77f   : > { %3467 = vmatpush3.bf16.msra.mxu1 %v3619_v49  ;;  %3470 = vmatprep.mubr.msk.bf16.mxu1 %vm3724_vm1, %v3723_v31  ;;  %v3628_v49 = vld [vmem:[%s3849_s24 + $0x38] sm:$0xff]   ;;  %s3726_s24 = smov 16  }
 0x780   : > { %3468 = vmatprep.subr.bf16.mxu1 %v3723_v31 }
 0x783   : > { %3469 = vmatpush3.bf16.msra.mxu1 %v3620_v51 }
 0x784   : > { %3482 = vmatprep.subr.bf16.mxu1 %v3723_v31 }
 0x786   : > { %3471 = vmatmul.mubr.msk.bf16.vlgmr.msra.gmra.mrb[32].mxu1 %vm919_vm2, %v3950_v36 }
 0x787   : > { %3484 = vmatprep.mubr.msk.bf16.mxu1 %vm3724_vm1, %v3723_v31 }
 0x7a0   : > { %v1924_v29 = vpop.f32.mrb[28].mxu0 }
 0x7a1   : > { %v1925_v30 = vadd.f32 %v3216_v28, %v1924_v29  ;;  %v3480_v32 = vpop.f32.mrb[29].mxu0  ;;  %v3629_v29 = vld [vmem:[%s4316_s27 + $0x30] sm:$0xff]  }
 0x7a2   : > { %v1927_v46 = vpop.f32.mrb[30].mxu0 }
 0x7a3   : > { %v1933_v33 = vpack.c.bf16 %v1925_v30, %v1925_v30  ;;  %v3481_v47 = vpop.f32.mrb[31].mxu0  ;;  %v1928_v51 = vadd.f32 %v3216_v28, %v1927_v46  ;;  %v3630_v30 = vld [vmem:[%s4316_s27 + $0x38] sm:$0xff]  }
 0x7a5   : > { %v1996_v34 = vsel %vm1157_vm4, %v1933_v33, 0  ;;  %v2046_v55 = vpack.c.bf16 %v1928_v51, %v1928_v51 }
 0x7a6   : > { %3489 = vmatpush3.bf16.msra.mxu0 %v1996_v34 }
 0x7a7   : > { %3500 = vmatprep.subr.bf16.mxu0 %v3723_v31 }
 0x849   : > { %v4068_v56 = vpop.f32.mrb[24].mxu1 }
 0x84a   : > { %v3444_v57 = vpop.f32.mrb[25].mxu1 }
 0x84b   : > { %v1612_v58 = vpop.f32.mrb[26].mxu1 }
 0x84c   : > { %v3445_v59 = vpop.f32.mrb[27].mxu1  ;;  %v2109_v58 = vsel %vm1157_vm4, %v2046_v55, 0 }
 0x851   : > { %v4070_v60 = vpop.f32.mrb[28].mxu1 }
 0x852   : > { %v3456_v61 = vpop.f32.mrb[29].mxu1 }
 0x853   : > { %v1725_v62 = vpop.f32.mrb[30].mxu1 }
 0x854   : > { %v3457_v63 = vpop.f32.mrb[31].mxu1  ;;  %v3625_v62 = vld [vmem:[%s4315_s3 + $0x30] sm:$0xff]  }
 0x859   : > { %v1858_v1 = vpop.f32.mrb[32].mxu1 }
 0x85a   : > { %v1859_v2 = vadd.f32 %v3207_v0, %v1858_v1  ;;  %v3472_v3 = vpop.f32.mrb[33].mxu1 }
 0x85b   : > { %v1861_v4 = vpop.f32.mrb[34].mxu1 }
 0x85c   : > { %v1932_v6 = vpack.c.bf16 %v1859_v2, %v1859_v2  ;;  %v3473_v7 = vpop.f32.mrb[35].mxu1  ;;  %v1862_v9 = vadd.f32 %v3207_v0, %v1861_v4  ;;  %v3626_v0 = vld [vmem:[%s4315_s3 + $0x38] sm:$0xff]   ;;  %s4321_s3 = scalar_lea.vmem %s4274_s14, %s3842_s20 }
 0x85e   : > { %v1938_v8 = vsel %vm1095_vm3, %v1932_v6, 0  ;;  %v2045_v11 = vpack.c.bf16 %v1862_v9, %v1862_v9 }
 0x85f   : > { %3483 = vmatpush3.bf16.xpose.msra.mxu1 %v1938_v8 }
 0x860   : > { %3494 = vmatprep.subr.bf16.mxu1 %v3723_v31  ;;  %v2051_v13 = vsel %vm1095_vm3, %v2045_v11, 0 }
 0x866   : > { %3485 = vmatmul.mubr.msk.bf16.vlgmr.msra.gmra.mrb[36].mxu1 %vm1095_vm3, %v1931_v12 }
 0x867   : > { %3495 = vmatpush3.bf16.xpose.msra.mxu1 %v2051_v13  ;;  %3496 = vmatprep.mubr.msk.bf16.mxu1 %vm3724_vm1, %v3723_v31  ;;  %v3238_v13 = vld [vmem:[%s3869_s23 + $0x3] ss:$0 sm:$0xff] }
 0x868   : > { %3506 = vmatprep.subr.bf16.mxu1 %v3723_v31 }
 0x86e   : > { %3497 = vmatmul.mubr.msk.bf16.vlgmr.msra.gmra.mrb[40].mxu1 %vm1095_vm3, %v2044_v15 }
 0x86f   : > { %3510 = vmatprep.mubr.msk.bf16.mxu1 %vm3724_vm1, %v3723_v31  ;;  %3507 = vmatpush3.bf16.msra.mxu1 %v3627_v48 }
 0x870   : > { %3508 = vmatprep.subr.bf16.mxu1 %v3723_v31 }
 0x873   : > { %3509 = vmatpush3.bf16.msra.mxu1 %v3628_v49 }
 0x874   : > { %3522 = vmatprep.subr.bf16.mxu1 %v3723_v31 }
 0x876   : > { %3511 = vmatmul.mubr.msk.bf16.vlgmr.msra.gmra.mrb[44].mxu1 %vm919_vm2, %v3950_v36 }
 0x877   : > { %3526 = vmatprep.mubr.msk.bf16.mxu1 %vm3724_vm1, %v3723_v31  ;;  %3523 = vmatpush3.bf16.msra.mxu1 %v3629_v29 }
 0x878   : > { %3524 = vmatprep.subr.bf16.mxu1 %v3723_v31 }
 0x87b   : > { %3525 = vmatpush3.bf16.msra.mxu1 %v3630_v30 }
 0x87c   : > { %3536 = vmatprep.subr.bf16.mxu1 %v3723_v31 }
 0x87e   : > { %3527 = vmatmul.mubr.msk.bf16.vlgmr.msra.gmra.mrb[48].mxu1 %vm919_vm2, %v3950_v36 }
 0x87f   : > { %3538 = vmatprep.mubr.msk.bf16.mxu1 %vm3724_vm1, %v3723_v31 }
 0x939   : > { %v1974_v18 = vpop.f32.mrb[36].mxu1 }
 0x93a   : > { %v3486_v19 = vpop.f32.mrb[37].mxu1  ;;  %v1980_v20 = vsel %vm1095_vm3, %v1974_v18, -inf }
 0x93b   : > { %1981 = vmax.xlane.f32.xlu0 %v1980_v20  ;;  %v1977_v21 = vpop.f32.mrb[38].mxu1 }
 0x93c   : > { %v3487_v22 = vpop.f32.mrb[39].mxu1 }
 0x941   : > { %v2087_v23 = vpop.f32.mrb[40].mxu1 }
 0x942   : > { %v3498_v24 = vpop.f32.mrb[41].mxu1  ;;  %v2093_v25 = vsel %vm1095_vm3, %v2087_v23, -inf }
 0x943   : > { %2094 = vmax.xlane.f32.xlu1 %v2093_v25  ;;  %v2090_v26 = vpop.f32.mrb[42].mxu1 }
 0x944   : > { %v3499_v27 = vpop.f32.mrb[43].mxu1 }
 0x949   : > { %v2215_v1 = vpop.f32.mrb[44].mxu1 }
 0x94a   : > { %v3512_v2 = vpop.f32.mrb[45].mxu1 }
 0x94b   : > { %v2218_v3 = vpop.f32.mrb[46].mxu1 }
 0x94c   : > { %v3513_v4 = vpop.f32.mrb[47].mxu1 }
 0x9c8   : > { %v1982_v35 = vpop.xlane.xlu0 %1981 }
 0x9c9   : > { %v1983_v37 = vsub.f32 %v1974_v18, %v1982_v35  ;;  %v3229_v18 = vld [vmem:[%s3864_s30 + $0x3] ss:$0 sm:$0xff]  ;;  %s3725_s30 = smov 8  }
 0x9ca   : > { %v2219_v27 = vadd.f32 %v3229_v18, %v2218_v3 }
 0x9cb   : > { %v1984_v38 = vmul.f32 1.442695, %v1983_v37 }
 0x9cc   : > { %v2467_v28 = vpack.c.bf16 %v2219_v27, %v2219_v27 }
 0x9cd   : > { %3655 = vpow2.f32 %v1984_v38 }
 0x9d0   : > { %v2095_v39 = vpop.xlane.xlu1 %2094 }
 0x9d1   : > { %v2096_v40 = vsub.f32 %v2087_v23, %v2095_v39  ;;  %v2216_v23 = vadd.f32 %v3229_v18, %v2215_v1 }
 0x9d3   : > { %v2097_v41 = vmul.f32 1.442695, %v2096_v40  ;;  %v2354_v25 = vpack.c.bf16 %v2216_v23, %v2216_v23 }
 0x9d5   : > { %3657 = vpow2.f32 %v2097_v41 }
 0x9d7   : > { %v3656_v42 = vpop.eup %3655 }
 0x9d8   : > { %v1986_v43 = vsel %vm1095_vm3, %v3656_v42, 0.0 }
 0x9d9   : > { %1987 = vadd.xlane.f32.xlu0 %v1986_v43 }
 0x9df   : > { %v3658_v44 = vpop.eup %3657 }
 0x9e0   : > { %v2099_v45 = vsel %vm1095_vm3, %v3658_v44, 0.0 }
 0x9e1   : > { %2100 = vadd.xlane.f32.xlu1 %v2099_v45 }
 0xa66   : > { %v1988_v50 = vpop.xlane.xlu0 %1987 }
 0xa67   : > { %3659 = vrcp.f32 %v1988_v50 }
 0xa6e   : > { %v2101_v52 = vpop.xlane.xlu1 %2100 }
 0xa6f   : > { %3661 = vrcp.f32 %v2101_v52  ;;  %v2347_v52 = vpop.f32.mrb[48].mxu1 }
 0xa71   : > { %v3660_v53 = vpop.eup %3659 }
 0xa72   : > { %v1990_v54 = vmul.f32 %v3660_v53, %v3656_v42  ;;  %v3528_v53 = vpop.f32.mrb[49].mxu1 }
 0xa73   : > { %v2350_v55 = vpop.f32.mrb[50].mxu1 }
 0xa74   : > { %v1991_v57 = vpack.c.bf16 %v1990_v54, %v1990_v54  ;;  %v3247_v54 = vld [vmem:[%s3874_s4 + $0x3] ss:$0 sm:$0xff]  ;;  %s3727_s4 = smov 24  }
 0xa76   : > { %3491 = vmatmul.mubr.msk.bf16.vlgmr.msra.gmra.mrb[32].mxu0 %vm1095_vm3, %v1991_v57  ;;  %v2348_v57 = vadd.f32 %v3247_v54, %v2347_v52 }
 0xa77   : > { %3501 = vmatpush3.bf16.msra.mxu0 %v2109_v58  ;;  %3502 = vmatprep.mubr.msk.bf16.mxu0 %vm3724_vm1, %v3723_v31  ;;  %v3529_v58 = vpop.f32.mrb[51].mxu1 }
 0xa78   : > { %3514 = vmatprep.subr.bf16.mxu0 %v3723_v31 }
 0xa79   : > { %v3662_v59 = vpop.eup %3661 }
 0xa7a   : > { %v2103_v61 = vmul.f32 %v3662_v59, %v3658_v44  ;;  %v2351_v59 = vadd.f32 %v3247_v54, %v2350_v55 }
 0xa7c   : > { %v2104_v63 = vpack.c.bf16 %v2103_v61, %v2103_v61  ;;  %v2356_v61 = vpack.c.bf16 %v2348_v57, %v2348_v57 }
 0xa7e   : > { %3503 = vmatmul.mubr.msk.bf16.vlgmr.msra.gmra.mrb[36].mxu0 %vm1095_vm3, %v2104_v63 }
 0xa7f   : > { %3515 = vmatpush3.bf16.msra.mxu0 %v3625_v62  ;;  %3518 = vmatprep.mubr.msk.bf16.mxu0 %vm3724_vm1, %v3723_v31  ;;  %v2419_v62 = vsel %vm1157_vm4, %v2356_v61, 0 }
 0xa80   : > { %3516 = vmatprep.subr.bf16.mxu0 %v3723_v31  ;;  %3537 = vmatpush3.bf16.msra.mxu1 %v2419_v62 }
 0xa81   : > { %3548 = vmatprep.subr.bf16.mxu1 %v3723_v31 }
 0xa83   : > { %3517 = vmatpush3.bf16.msra.mxu0 %v3626_v0 }
 0xa84   : > { %3530 = vmatprep.subr.bf16.mxu0 %v3723_v31 }
 0xa86   : > { %3519 = vmatmul.mubr.msk.bf16.vlgmr.msra.gmra.mrb[40].mxu0 %vm919_vm2, %v3950_v36 }
 0xa87   : > { %3532 = vmatprep.mubr.msk.bf16.mxu0 %vm3724_vm1, %v3723_v31 }
 0xb49   : > { %v4123_v5 = vpop.f32.mrb[32].mxu0 }
 0xb4a   : > { %v3492_v6 = vpop.f32.mrb[33].mxu0 }
 0xb4b   : > { %v2035_v7 = vpop.f32.mrb[34].mxu0 }
 0xb4c   : > { %v3493_v8 = vpop.f32.mrb[35].mxu0 }
 0xb51   : > { %v4125_v9 = vpop.f32.mrb[36].mxu0 }
 0xb52   : > { %v3504_v10 = vpop.f32.mrb[37].mxu0 }
 0xb53   : > { %v2148_v11 = vpop.f32.mrb[38].mxu0 }
 0xb54   : > { %v3505_v12 = vpop.f32.mrb[39].mxu0  ;;  %v3631_v11 = vld [vmem:[%s3884_s19] sm:$0xff]  }
 0xb55   : > { %v3632_v12 = vld [vmem:[%s3884_s19 + $0x8] sm:$0xff]  }
 0xb59   : > { %v2281_v14 = vpop.f32.mrb[40].mxu0 }
 0xb5a   : > { %v2282_v15 = vadd.f32 %v3238_v13, %v2281_v14  ;;  %v3520_v16 = vpop.f32.mrb[41].mxu0 }
 0xb5b   : > { %v2284_v17 = vpop.f32.mrb[42].mxu0 }
 0xb5c   : > { %v2355_v19 = vpack.c.bf16 %v2282_v15, %v2282_v15  ;;  %v3521_v20 = vpop.f32.mrb[43].mxu0  ;;  %v2285_v22 = vadd.f32 %v3238_v13, %v2284_v17 }
 0xb5e   : > { %v2361_v21 = vsel %vm1095_vm3, %v2355_v19, 0  ;;  %v2468_v24 = vpack.c.bf16 %v2285_v22, %v2285_v22 }
 0xb5f   : > { %3531 = vmatpush3.bf16.xpose.msra.mxu0 %v2361_v21 }
 0xb60   : > { %3542 = vmatprep.subr.bf16.mxu0 %v3723_v31  ;;  %v2474_v26 = vsel %vm1095_vm3, %v2468_v24, 0 }
 0xb66   : > { %3533 = vmatmul.mubr.msk.bf16.vlgmr.msra.gmra.mrb[44].mxu0 %vm1095_vm3, %v2354_v25 }
 0xb67   : > { %3543 = vmatpush3.bf16.xpose.msra.mxu0 %v2474_v26  ;;  %3544 = vmatprep.mubr.msk.bf16.mxu0 %vm3724_vm1, %v3723_v31  ;;  %v3255_v26 = vld [vmem:[%s4318_s5] ss:$0 sm:$0xff]  ;;  %s2923_s5 = sshll.u32 %s3728_s28, 4  ;;  %s2924_s5 = int_to_ptr.vmem [resolvable:$true] %s2923_s5 }
 0xb68   : > { %3554 = vmatprep.subr.bf16.mxu0 %v3723_v31  ;;  %p3692_p9 = scmp.lt.s32.totalorder %s2924_s5, %s2924_s5 }
 0xb6e   : > { %3545 = vmatmul.mubr.msk.bf16.vlgmr.msra.gmra.mrb[48].mxu0 %vm1095_vm3, %v2467_v28 }
 0xb6f   : > { %3558 = vmatprep.mubr.msk.bf16.mxu0 %vm3724_vm1, %v3723_v31  ;;  %3555 = vmatpush3.bf16.msra.mxu0 %v3631_v11 }
 0xb70   : > { %3556 = vmatprep.subr.bf16.mxu0 %v3723_v31 }
 0xb73   : > { %3557 = vmatpush3.bf16.msra.mxu0 %v3632_v12 }
 0xb74   : > { %3570 = vmatprep.subr.bf16.mxu0 %v3723_v31 }
 0xc39   : > { %v2397_v32 = vpop.f32.mrb[44].mxu0 }
 0xc3a   : > { %v3534_v33 = vpop.f32.mrb[45].mxu0  ;;  %v2403_v34 = vsel %vm1095_vm3, %v2397_v32, -inf }
 0xc3b   : > { %2404 = vmax.xlane.f32.xlu0 %v2403_v34  ;;  %v2400_v35 = vpop.f32.mrb[46].mxu0  ;;  %v3683_v34 = vld [vmem:[#allocation2] sm:$0xff] }
 0xc3c   : > { %v3535_v37 = vpop.f32.mrb[47].mxu0 }
 0xc41   : > { %v2510_v38 = vpop.f32.mrb[48].mxu0 }
 0xc42   : > { %v3546_v39 = vpop.f32.mrb[49].mxu0  ;;  %v2516_v40 = vsel %vm1095_vm3, %v2510_v38, -inf }
 0xc43   : > { %2517 = vmax.xlane.f32.xlu1 %v2516_v40  ;;  %v2513_v41 = vpop.f32.mrb[50].mxu0 }
 0xc44   : > { %v3547_v42 = vpop.f32.mrb[51].mxu0 }
 0xcc8   : > { %v2405_v43 = vpop.xlane.xlu0 %2404 }
 0xcc9   : > { %v2406_v36 = vsub.f32 %v2397_v32, %v2405_v43 }
 0xccb   : > { %v2407_v44 = vmul.f32 1.442695, %v2406_v36 }
 0xccd   : > { %3663 = vpow2.f32 %v2407_v44 }
 0xcd0   : > { %v2518_v45 = vpop.xlane.xlu1 %2517 }
 0xcd1   : > { %v2519_v46 = vsub.f32 %v2510_v38, %v2518_v45  ;;  %v3684_v38 = vld [vmem:[#allocation2 + $0x8] sm:$0xff] }
 0xcd3   : > { %v2520_v47 = vmul.f32 1.442695, %v2519_v46 }
 0xcd5   : > { %3665 = vpow2.f32 %v2520_v47 }
 0xcd7   : > { %v3664_v48 = vpop.eup %3663 }
 0xcd8   : > { %v2409_v49 = vsel %vm1095_vm3, %v3664_v48, 0.0 }
 0xcd9   : > { %2410 = vadd.xlane.f32.xlu0 %v2409_v49 }
 0xcdf   : > { %v3666_v50 = vpop.eup %3665 }
 0xce0   : > { %v2522_v51 = vsel %vm1095_vm3, %v3666_v50, 0.0 }
 0xce1   : > { %2523 = vadd.xlane.f32.xlu1 %v2522_v51  ;;  %v3634_v51 = vld [vmem:[%s3897_s8 + $0x8] sm:$0xff]  }
 0xcef   : > { %1616 = vrot.lane.b32.xlu0 %v4068_v56, %s3725_s30 }
 0xcf2   : > { %1729 = vrot.lane.b32.xlu1 %v4070_v60, %s3725_s30  ;;  %v2469_v60 = vpack.c.bf16 %v2351_v59, %v2351_v59 }
 0xcf4   : > { %v2532_v6 = vsel %vm1157_vm4, %v2469_v60, 0 }
 0xcf6   : > { %2039 = vrot.lane.b32.xlu1 %v4123_v5, %s3726_s24 }
 0xcfa   : > { %2152 = vrot.lane.b32.xlu1 %v4125_v9, %s3726_s24 }
 0xd66   : > { %v2411_v63 = vpop.xlane.xlu0 %2410 }
 0xd67   : > { %3667 = vrcp.f32 %v2411_v63 }
 0xd6a   : > { %v1617_v0 = vpop.permute.xlu0 %1616 }
 0xd6b   : > { %1620 = vst.msk [vmem:[#allocation3] sm:$0xff] %vm1619_vm5, %v1617_v0 }
 0xd6e   : > { %v2524_v56 = vpop.xlane.xlu1 %2523 }
 0xd6f   : > { %3669 = vrcp.f32 %v2524_v56 }
 0xd71   : > { %v3668_v1 = vpop.eup %3667 }
 0xd72   : > { %v2413_v2 = vmul.f32 %v3668_v1, %v3664_v48  ;;  %v1730_v3 = vpop.permute.xlu1 %1729  ;;  %v3260_v1 = vld [vmem:[%s4320_s0] ss:$0 sm:$0xff] }
 0xd73   : > { %1732 = vst.msk [vmem:[#allocation3 + $0x8] sm:$0xff] %vm1619_vm5, %v1730_v3 }
 0xd74   : > { %v2414_v4 = vpack.c.bf16 %v2413_v2, %v2413_v2 }
 0xd76   : > { %v2040_v5 = vpop.permute.xlu1 %2039  ;;  %3539 = vmatmul.mubr.msk.bf16.vlgmr.msra.gmra.mrb[52].mxu1 %vm1095_vm3, %v2414_v4 }
 0xd77   : > { %2043 = vst.msk [vmem:[#allocation3] sm:$0xff] %vm2042_vm6, %v2040_v5  ;;  %3549 = vmatpush3.bf16.msra.mxu1 %v2532_v6  ;;  %3550 = vmatprep.mubr.msk.bf16.mxu1 %vm3724_vm1, %v3723_v31  ;;  %v3635_v6 = vld [vmem:[%s3907_s10] sm:$0xff]   ;;  %v3636_v5 = vld [vmem:[%s3907_s10 + $0x8] sm:$0xff]  }
 0xd78   : > { %3562 = vmatprep.subr.bf16.mxu1 %v3723_v31 }
 0xd79   : > { %v3670_v7 = vpop.eup %3669 }
 0xd7a   : > { %v2526_v8 = vmul.f32 %v3670_v7, %v3666_v50  ;;  %v2153_v9 = vpop.permute.xlu1 %2152  ;;  %v3633_v50 = vld [vmem:[%s3897_s8] sm:$0xff]   ;;  %s4319_s8 = scalar_lea.vmem %s4271_s11, %s3842_s20  ;;  %v3637_v7 = vld [vmem:[%s3907_s10 + $0x10] sm:$0xff]   ;;  %s3685_s20 = scalar_lea.vmem %s2924_s5, 256 }
 0xd7b   : > { %2155 = vst.msk [vmem:[#allocation3 + $0x8] sm:$0xff] %vm2042_vm6, %v2153_v9  ;;  %v3259_v62 = vld [vmem:[%s4319_s8] ss:$0 sm:$0xff]  ;;  %p3686_p6 = scmp.ne.s32.totalorder %s2924_s5, %s3685_s20  ;;  %p3693_p10 = scmp.lt.s32.totalorder %s3685_s20, %s3685_s20 }
 0xd7c   : > { %v2527_v10 = vpack.c.bf16 %v2526_v8, %v2526_v8  ;;  %v3638_v8 = vld [vmem:[%s3907_s10 + $0x18] sm:$0xff]   ;;  %v3261_v9 = vld [vmem:[%s4321_s3] ss:$0 sm:$0xff] }
 0xd7d   : > { %p3694_p11 = por %p3693_p10, %p3692_p9 }
 0xd7e   : > { %3551 = vmatmul.mubr.msk.bf16.vlgmr.msra.gmra.mrb[56].mxu1 %vm1095_vm3, %v2527_v10 }
 0xd7f   : > { %3566 = vmatprep.mubr.msk.bf16.mxu1 %vm3724_vm1, %v3723_v31  ;;  %3563 = vmatpush3.bf16.msra.mxu1 %v3633_v50 }
 0xd80   : > { %3564 = vmatprep.subr.bf16.mxu1 %v3723_v31 }
 0xd83   : > { %3565 = vmatpush3.bf16.msra.mxu1 %v3634_v51 }
 0xe49   : > { %v2455_v13 = vpop.f32.mrb[52].mxu1 }
 0xe4a   : > { %2462 = vrot.lane.b32.xlu0 %v2455_v13, %s3727_s4  ;;  %v3540_v14 = vpop.f32.mrb[53].mxu1 }
 0xe4b   : > { %v2458_v15 = vpop.f32.mrb[54].mxu1 }
 0xe4c   : > { %v3541_v16 = vpop.f32.mrb[55].mxu1 }
 0xe51   : > { %v2568_v17 = vpop.f32.mrb[56].mxu1 }
 0xe52   : > { %2575 = vrot.lane.b32.xlu1 %v2568_v17, %s3727_s4  ;;  %v3552_v18 = vpop.f32.mrb[57].mxu1 }
 0xe53   : > { %v2571_v19 = vpop.f32.mrb[58].mxu1 }
 0xe54   : > { %v3553_v20 = vpop.f32.mrb[59].mxu1 }
 0xebc   : > { %v2463_v21 = vpop.permute.xlu0 %2462 }
 0xebd   : > { %2466 = vst.msk [vmem:[#allocation3] sm:$0xff] %vm2465_vm7, %v2463_v21 }
 0xec4   : > { %v2576_v22 = vpop.permute.xlu1 %2575  ;;  %v2579_v23 = vld [vmem:[#allocation3] sm:$0xff] }
 0xec5   : > { %2578 = vst.msk [vmem:[#allocation3 + $0x8] sm:$0xff] %vm2465_vm7, %v2576_v22 }
 0xecc   : > { %v2580_v24 = vld [vmem:[#allocation3 + $0x8] sm:$0xff] }
 0xecd   : > { %v2581_v25 = vpack.c.bf16 %v2580_v24, %v2579_v23 }
 0xecf   : > { %3559 = vmatmul.mubr.msk.bf16.vlgmr.msra.gmra.mrb[52].mxu0 %vm919_vm2, %v2581_v25 }
 0xed0   : > { %3578 = vmatprep.mubr.msk.bf16.mxu0 %vm3724_vm1, %v3723_v31  ;;  %3571 = vmatpush3.bf16.msra.mxu0 %v3635_v6 }
 0xed1   : > { %3572 = vmatprep.subr.bf16.mxu0 %v3723_v31 }
 0xed4   : > { %3573 = vmatpush3.bf16.msra.mxu0 %v3636_v5 }
 0xed5   : > { %3574 = vmatprep.subr.bf16.mxu0 %v3723_v31 }
 0xed8   : > { %3575 = vmatpush3.bf16.msra.mxu0 %v3637_v7 }
 0xed9   : > { %3576 = vmatprep.subr.bf16.mxu0 %v3723_v31 }
 0xedc   : > { %3577 = vmatpush3.bf16.msra.mxu0 %v3638_v8 }
 0xfa2   : > { %v2642_v27 = vpop.f32.mrb[52].mxu0 }
 0xfa3   : > { %v2643_v28 = vadd.f32 %v3255_v26, %v2642_v27  ;;  %v3560_v29 = vpop.f32.mrb[53].mxu0 }
 0xfa4   : > { %v2645_v30 = vpop.f32.mrb[54].mxu0 }
 0xfa5   : > { %v2646_v32 = vadd.f32 %v3255_v26, %v2645_v30  ;;  %v3561_v33 = vpop.f32.mrb[55].mxu0  ;;  %v2649_v35 = vadd.f32 %v3683_v34, %v2643_v28 }
 0xfa7   : > { %v2653_v37 = vsel %vm919_vm2, %v2649_v35, 0.0  ;;  %v2650_v39 = vadd.f32 %v3684_v38, %v2646_v32 }
 0xfa8   : > { %2654 = vadd.xlane.f32.xlu0 %v2653_v37 }
 0xfa9   : > { %v2656_v40 = vsel %vm919_vm2, %v2650_v39, 0.0 }
 0xfaa   : > { %2657 = vadd.xlane.f32.xlu1 %v2656_v40 }
0x1035   : > { %v2655_v41 = vpop.xlane.xlu0 %2654 }
0x1036   : > { %v2660_v42 = vmul.f32 0.03125, %v2655_v41 }
0x1037   : > { %v2658_v43 = vpop.xlane.xlu1 %2657 }
0x1038   : > { %v2662_v36 = vsub.f32 %v2649_v35, %v2660_v42  ;;  %v2661_v44 = vmul.f32 0.03125, %v2658_v43  ;;  %v3265_v35 = vld [vmem:[%s831_s7] ss:$0 sm:$0xff]  ;;  %s4322_s7 = sld [smem:[#allocation8_spill]] }
0x103a   : > { %v2663_v45 = vsub.f32 %v2650_v39, %v2661_v44  ;;  %v2664_v46 = vmul.f32 %v2662_v36, %v2662_v36 }
0x103c   : > { %v2666_v47 = vsel %vm919_vm2, %v2664_v46, 0.0  ;;  %v2665_v48 = vmul.f32 %v2663_v45, %v2663_v45 }
0x103d   : > { %2667 = vadd.xlane.f32.xlu0 %v2666_v47 }
0x103e   : > { %v2669_v49 = vsel %vm919_vm2, %v2665_v48, 0.0  ;;  %p3586_p5 = scmp.eq.s32.totalorder %s4322_s7, 1 }
0x1040   : > { %p3687_p7 = pnand %p3686_p6, %p3586_p5 }
0x1041   : > { %2670 = vadd.xlane.f32.xlu0 %v2669_v49 }
0x1042   : > { %p3688_p8 = pneg %p3687_p7 }
0x1044   : > { %p3695_p12 = pnand %p3694_p11, %p3688_p8 }
0x10ca   : > { %v2668_v52 = vpop.xlane.xlu0 %2667 }
0x10cb   : > { %v2672_v53 = vmul.f32 0.03125, %v2668_v52 }
0x10cd   : > { %v2674_v54 = vadd.f32 1e-12, %v2672_v53 }
0x10ce   : > { %v2671_v55 = vpop.xlane.xlu0 %2670 }
0x10cf   : > { %3671 = vrsqrt.f32 %v2674_v54  ;;  %v2673_v57 = vmul.f32 0.03125, %v2671_v55 }
0x10d1   : > { %v2675_v58 = vadd.f32 1e-12, %v2673_v57 }
0x10d3   : > { %3673 = vrsqrt.f32 %v2675_v58 }
0x10d9   : > { %v3672_v59 = vpop.eup %3671 }
0x10da   : > { %v2678_v61 = vmul.f32 %v3672_v59, %v2662_v36 }
0x10dc   : > { %v2686_v0 = vmul.f32 %v3259_v62, %v2678_v61 }
0x10dd   : > { %v3674_v63 = vpop.eup %3673 }
0x10de   : > { %v2679_v56 = vmul.f32 %v3674_v63, %v2663_v45  ;;  %v2694_v60 = vadd.f32 %v3260_v1, %v2686_v0 }
0x10e0   : > { %v2687_v2 = vmul.f32 %v3259_v62, %v2679_v56  ;;  %v3271_v56 = vld [vmem:[%s834_s1] ss:$0 sm:$0xff] }
0x10e2   : > { %v2695_v3 = vadd.f32 %v3260_v1, %v2687_v2 }
0x10e4   : > { %v2696_v4 = vpack.c.bf16 %v2695_v3, %v2694_v60 }
0x10e6   : > { %3567 = vmatmul.mubr.msk.bf16.vlgmr.msra.gmra.mrb[60].mxu1 %vm919_vm2, %v2696_v4 }
0x11b9   : > { %v2757_v10 = vpop.f32.mrb[60].mxu1 }
0x11ba   : > { %v2758_v11 = vadd.f32 %v3261_v9, %v2757_v10  ;;  %v3568_v12 = vpop.f32.mrb[61].mxu1 }
0x11bb   : > { %v2760_v13 = vpop.f32.mrb[62].mxu1 }
0x11bc   : > { %v2764_v14 = vmul.f32 %v2758_v11, %v2758_v11  ;;  %v2761_v15 = vadd.f32 %v3261_v9, %v2760_v13  ;;  %v3569_v16 = vpop.f32.mrb[63].mxu1 }
0x11be   : > { %v2766_v17 = vmul.f32 %v2764_v14, %v2758_v11  ;;  %v2765_v18 = vmul.f32 %v2761_v15, %v2761_v15 }
0x11c0   : > { %v2768_v19 = vmul.f32 0.044715, %v2766_v17  ;;  %v2767_v20 = vmul.f32 %v2765_v18, %v2761_v15 }
0x11c2   : > { %v2770_v21 = vadd.f32 %v2768_v19, %v2758_v11  ;;  %v2769_v31 = vmul.f32 0.044715, %v2767_v20 }
0x11c4   : > { %v2772_v22 = vmul.f32 0.7978846, %v2770_v21  ;;  %v2771_v23 = vadd.f32 %v2769_v31, %v2761_v15 }
0x11c6   : > { %3675 = vtanh.f32 %v2772_v22  ;;  %v2773_v24 = vmul.f32 0.7978846, %v2771_v23 }
0x11c8   : > { %3677 = vtanh.f32 %v2773_v24 }
0x11d0   : > { %v3676_v25 = vpop.eup %3675 }
0x11d1   : > { %v2776_v26 = vadd.f32 1.0, %v3676_v25 }
0x11d2   : > { %v3678_v27 = vpop.eup %3677 }
0x11d3   : > { %v2778_v28 = vmul.f32 0.5, %v2776_v26  ;;  %v2777_v29 = vadd.f32 1.0, %v3678_v27 }
0x11d5   : > { %v2779_v30 = vmul.f32 0.5, %v2777_v29  ;;  %v2780_v32 = vmul.f32 %v2778_v28, %v2758_v11 }
0x11d7   : > { %v2781_v33 = vmul.f32 %v2779_v30, %v2761_v15 }
0x11d9   : > { %v2782_v34 = vpack.c.bf16 %v2781_v33, %v2780_v32 }
0x11db   : > { %3579 = vmatmul.mubr.msk.bf16.vlgmr.msra.gmra.mrb[56].mxu0 %vm2822_vm8, %v2782_v34 }
0x12ae   : > { %v2860_v37 = vpop.f32.mrb[56].mxu0 }
0x12af   : > { %v2861_v38 = vadd.f32 %v3265_v35, %v2860_v37  ;;  %v3580_v39 = vpop.f32.mrb[57].mxu0 }
0x12b0   : > { %v2863_v40 = vpop.f32.mrb[58].mxu0 }
0x12b1   : > { %v2864_v41 = vadd.f32 %v3265_v35, %v2863_v40  ;;  %v3581_v42 = vpop.f32.mrb[59].mxu0  ;;  %v2867_v43 = vadd.f32 %v2861_v38, %v2694_v60  ;;  %v3272_v60 = vld [vmem:[%s837_s22] ss:$0 sm:$0xff] }
0x12b3   : > { %v2871_v36 = vsel %vm919_vm2, %v2867_v43, 0.0  ;;  %v2868_v44 = vadd.f32 %v2864_v41, %v2695_v3 }
0x12b4   : > { %2872 = vadd.xlane.f32.xlu0 %v2871_v36 }
0x12b5   : > { %v2874_v45 = vsel %vm919_vm2, %v2868_v44, 0.0 }
0x12b6   : > { %2875 = vadd.xlane.f32.xlu1 %v2874_v45 }
0x1341   : > { %v2873_v46 = vpop.xlane.xlu0 %2872 }
0x1342   : > { %v2877_v47 = vmul.f32 0.03125, %v2873_v46 }
0x1343   : > { %v2876_v48 = vpop.xlane.xlu1 %2875 }
0x1344   : > { %v2879_v49 = vsub.f32 %v2867_v43, %v2877_v47  ;;  %v2878_v50 = vmul.f32 0.03125, %v2876_v48 }
0x1346   : > { %v2880_v51 = vsub.f32 %v2868_v44, %v2878_v50  ;;  %v2881_v52 = vmul.f32 %v2879_v49, %v2879_v49 }
0x1348   : > { %v2883_v53 = vsel %vm919_vm2, %v2881_v52, 0.0  ;;  %v2882_v54 = vmul.f32 %v2880_v51, %v2880_v51 }
0x1349   : > { %2884 = vadd.xlane.f32.xlu0 %v2883_v53 }
0x134a   : > { %v2886_v55 = vsel %vm919_vm2, %v2882_v54, 0.0 }
0x134b   : > { %2887 = vadd.xlane.f32.xlu1 %v2886_v55 }
0x13d6   : > { %v2885_v57 = vpop.xlane.xlu0 %2884 }
0x13d7   : > { %v2889_v58 = vmul.f32 0.03125, %v2885_v57 }
0x13d8   : > { %v2888_v59 = vpop.xlane.xlu1 %2887 }
0x13d9   : > { %v2891_v61 = vadd.f32 1e-12, %v2889_v58  ;;  %v2890_v62 = vmul.f32 0.03125, %v2888_v59 }
0x13db   : > { %3679 = vrsqrt.f32 %v2891_v61  ;;  %v2892_v63 = vadd.f32 1e-12, %v2890_v62 }
0x13dd   : > { %3681 = vrsqrt.f32 %v2892_v63 }
0x13e5   : > { %v3680_v0 = vpop.eup %3679 }
0x13e6   : > { %v2895_v1 = vmul.f32 %v3680_v0, %v2879_v49 }
0x13e7   : > { %v3682_v2 = vpop.eup %3681 }
0x13e8   : > { %v2896_v3 = vmul.f32 %v3682_v2, %v2880_v51  ;;  %v2903_v4 = vmul.f32 %v3271_v56, %v2895_v1 }
0x13ea   : > { %v2904_v6 = vmul.f32 %v3271_v56, %v2896_v3  ;;  %v2911_v5 = vadd.f32 %v3272_v60, %v2903_v4 }
0x13ec   : > { %v2912_v7 = vadd.f32 %v3272_v60, %v2904_v6  ;;  %2913 = vst.msk [vmem:[#allocation2] sm:$0xff] %vm919_vm2, %v2911_v5  ;;  %2915 = vst.msk [vmem:[#allocation4] sm:$0xff] %vm919_vm2, %v2911_v5 }
0x13ee   : > { %2914 = vst.msk [vmem:[#allocation2 + $0x8] sm:$0xff] %vm919_vm2, %v2912_v7  ;;  %2916 = vst.msk [vmem:[#allocation4 + $0x8] sm:$0xff] %vm919_vm2, %v2912_v7 }
0x13ef   : > { %3698 = shalt.err (!%p3695_p12)
}
0x13f0   : > { %s4323_s29 = sld [smem:[#allocation22_spill]] }
0x13f6   : > { %s3699_s21 = scalar_lea.hbm %s4323_s29, 256 }
0x13f7   : > { %p3700_p13 = scmp.ne.s32.totalorder %s4323_s29, %s3699_s21  ;;  %p3705_p2 = scmp.lt.u32.totalorder %s3699_s21, %s4323_s29 }
0x13f9   : > { %p3701_p0 = pnand %p3700_p13, %p3586_p5 }
0x13fb   : > { %p3702_p1 = pneg %p3701_p0 }
0x13fd   : > { %p3707_p3 = pnand %p3705_p2, %p3702_p1 }
0x13ff   : > { %3710 = shalt.err (!%p3707_p3)
}
0x1400   : > { %s3729_s2 = smov 128  }
0x1401   : > { %3583 = dma.vmem_to_hbm [thread:$0]  (%p3586_p5), %s2924_s5, 256, %s4323_s29, [#allocation5], %s3729_s2, %s3729_s2, %s3725_s30  }
0x1402   : > { %3716 = dma.done.wait (%p3586_p5), [#allocation5], 256  }
0x1403   : > { %3718 = vsyncadd (%p3586_p5), [#allocation5], 4294967040 }
0x1404 PF: > { %s4324_s10 = sld [smem:[#allocation7_spill]] }
0x140a   : > { %s30_s0 = sadd.s32 1, %s4324_s10  }
0x140b   : > { %p27_p4 = scmp.ge.s32.totalorder %s30_s0, 4  }
0x140d   :  { %29 = sbr.rel (!%p27_p4) target bundleno = 14 (0xe), region = 190 }
0x1414   :  { %2939 = vsyncpa [#allocation5], 1 }
0x1415   :  { %2941 = vsyncpa [#allocation5 + $0x1], 1 }

</bundles_post_ra>
